<compile_context>
chip_gen: v5e
topology: v5e:2x2
jax: 0.10.0
libtpu: 0.0.40
codegen_flags: <defaults>
</compile_context>

<pallas_src>
import functools

import jax
import jax.numpy as jnp
from jax.experimental import pallas as pl
from jax.experimental.pallas import tpu as pltpu

_BN_EPS = 1e-3


def _round_up(v, m):
    return (v + m - 1) // m * m


def _vmem_limit_bytes():
    """75% of physical VMEM (headroom for compiler scratch), capped at 100MiB."""
    try:
        info = pltpu.get_tpu_info()
        cap = getattr(info, "vmem_capacity_bytes", None)
        if cap:
            return int(min(cap * 3 // 4, 100 * 1024 * 1024))
    except Exception:
        pass
    return None  # fall back to the compiler default


# ----------------------------------------------------------------------------
# Pallas kernel: fused direct conv (deep-K im2col GEMM) + folded-BN bias + ReLU
# ----------------------------------------------------------------------------
def _conv_bn_relu_kernel(x_ref, w_ref, b_ref, o_ref, *, k, stride, ho, wo,
                         row_tile):
    """x_ref: [1, Hp, Wp, Cin_p]        bf16, spatially + channel padded image
       w_ref: [k*k*Cin_p, Cout_t]       bf16, BN scale folded in
       b_ref: [1, Cout_t]               f32, folded-BN bias
       o_ref: [1, Ho*Wo, Cout_t]
    """
    cin_p = x_ref.shape[-1]
    bias = b_ref[...]                               # [1, Cout_t] f32 (hoisted)

    # Static loop over output-row tiles: each tile builds its im2col patch in
    # VMEM and runs a single deep-K MXU dot, then stores immediately (no
    # accumulator lives across iterations -> no vreg spills).
    for r0 in range(0, ho, row_tile):
        rows = min(row_tile, ho - r0)
        taps = []
        for i in range(k):
            for j in range(k):
                if stride == 1:
                    xs = x_ref[0, pl.ds(r0 + i, rows), pl.ds(j, wo), :]
                else:
                    xs = x_ref[0, pl.ds(r0 * stride + i, rows, stride),
                               pl.ds(j, wo, stride), :]
                taps.append(xs)                      # [rows, wo, Cin_p] bf16
        patch = jnp.concatenate(taps, axis=-1)       # [rows, wo, k*k*Cin_p]
        patch = patch.reshape(rows * wo, k * k * cin_p)
        acc = jnp.dot(patch, w_ref[...],
                      preferred_element_type=jnp.float32)   # fp32 accumulate
        out = jnp.maximum(acc + bias, 0.0)           # folded-BN bias + ReLU
        o_ref[0, pl.ds(r0 * wo, rows * wo), :] = out.astype(o_ref.dtype)


def _conv_bn_relu(x, w, b, *, k, stride, ho, wo, out_dtype=jnp.float32):
    """x: [N, Hp, Wp, Cin_p] bf16, w: [k*k*Cin_p, Cout_p] bf16, b: [1, Cout_p]."""
    n, hp, wp, cin_p = x.shape
    kkc, cout_p = w.shape

    # Cout tile: 256 fills the 256-wide MXU on v6e/v7x; 128 otherwise (v5e /
    # small layers). Output last dim is always a multiple of 128 -> lane-dense
    # unmasked stores.
    cout_tile = 256 if cout_p % 256 == 0 else 128
    # Keep each GEMM's M around <=512 rows so the dot result + epilogue fit
    # comfortably without thrashing the register file.
    row_tile = max(1, min(ho, 512 // max(wo, 1)))

    kernel = functools.partial(_conv_bn_relu_kernel, k=k, stride=stride,
                               ho=ho, wo=wo, row_tile=row_tile)

    flops = 2 * n * ho * wo * kkc * cout_p
    bytes_accessed = (x.size * x.dtype.itemsize
                      + w.size * w.dtype.itemsize
                      + b.size * b.dtype.itemsize
                      + n * ho * wo * cout_p * jnp.dtype(out_dtype).itemsize)

    cp_kwargs = dict(dimension_semantics=("parallel", "parallel"))
    vl = _vmem_limit_bytes()
    if vl is not None:
        cp_kwargs["vmem_limit_bytes"] = vl

    return pl.pallas_call(
        kernel,
        out_shape=jax.ShapeDtypeStruct((n, ho * wo, cout_p), out_dtype),
        grid=(n, cout_p // cout_tile),
        in_specs=[
            pl.BlockSpec((1, hp, wp, cin_p), lambda i, c: (i, 0, 0, 0)),
            pl.BlockSpec((kkc, cout_tile), lambda i, c: (0, c)),
            pl.BlockSpec((1, cout_tile), lambda i, c: (0, c)),
        ],
        out_specs=pl.BlockSpec((1, ho * wo, cout_tile), lambda i, c: (i, 0, c)),
        compiler_params=pltpu.CompilerParams(**cp_kwargs),
        cost_estimate=pl.CostEstimate(flops=int(flops), transcendentals=0,
                                      bytes_accessed=int(bytes_accessed)),
    )(x, w, b)


# ----------------------------------------------------------------------------
# Parameter handling (PyTorch-style params -> packed, BN-folded, padded, bf16)
# ----------------------------------------------------------------------------
def init_params(key, inp, oup, kernel_size):
    """PyTorch-layout parameters for BasicConv2d (fresh-module BN stats)."""
    fan_in = inp * kernel_size * kernel_size
    w = jax.random.normal(key, (oup, inp, kernel_size, kernel_size),
                          jnp.float32) / (fan_in ** 0.5)
    return {
        'conv_w': w,                                   # [Cout, Cin, kh, kw]
        'gamma': jnp.ones((oup,), jnp.float32),
        'beta': jnp.zeros((oup,), jnp.float32),
        'running_mean': jnp.zeros((oup,), jnp.float32),
        'running_var': jnp.ones((oup,), jnp.float32),
    }


def pack_params(params, kernel_size, eps=_BN_EPS):
    """Fold BN into the conv weight, pad/reshape to [k*k*Cin_p, Cout_p] bf16."""
    k = kernel_size
    cout, cin = params['conv_w'].shape[:2]
    cin_p = _round_up(cin, 8)        # sublane alignment of the contraction axis
    cout_p = _round_up(cout, 128)    # lane-dense output stores

    scale = params['gamma'] / jnp.sqrt(params['running_var'] + eps)
    bias = params['beta'] - params['running_mean'] * scale

    # [Cout, Cin, kh, kw] -> [kh, kw, Cin, Cout], BN scale folded into weights,
    # then flatten taps+Cin into one deep contraction axis.
    w = jnp.transpose(params['conv_w'], (2, 3, 1, 0)) * scale[None, None, None, :]
    w = jnp.pad(w, ((0, 0), (0, 0), (0, cin_p - cin), (0, cout_p - cout)))
    w = w.reshape(k * k * cin_p, cout_p).astype(jnp.bfloat16)
    b = jnp.pad(bias, (0, cout_p - cout)).reshape(1, cout_p).astype(jnp.float32)
    return {'w': w, 'b': b}


# ----------------------------------------------------------------------------
# Forward pass
# ----------------------------------------------------------------------------
def basic_conv2d_forward_nhwc(packed, x_nhwc, *, kernel_size, stride, padding,
                              out_channels, out_dtype=jnp.float32):
    """NHWC in / NHWC out — no layout transposes around the kernel."""
    k = kernel_size
    n, h, w_in, cin = x_nhwc.shape
    cin_p = packed['w'].shape[0] // (k * k)
    ho = (h + 2 * padding - k) // stride + 1
    wo = (w_in + 2 * padding - k) // stride + 1

    # One fused cast+pad pass (spatial halo for conv padding, channel padding
    # for alignment); zero input channels hit zero weight rows -> no effect.
    x = x_nhwc.astype(jnp.bfloat16)
    x = jnp.pad(x, ((0, 0), (padding, padding), (padding, padding),
                    (0, cin_p - cin)))

    out = _conv_bn_relu(x, packed['w'], packed['b'],
                        k=k, stride=stride, ho=ho, wo=wo, out_dtype=out_dtype)
    return out[:, :, :out_channels].reshape(n, ho, wo, out_channels)


def basic_conv2d_forward(packed, x_nchw, *, kernel_size, stride, padding,
                         out_channels, out_dtype=jnp.float32):
    """NCHW in / NCHW out, matching the PyTorch module exactly."""
    x = jnp.transpose(x_nchw, (0, 2, 3, 1))
    y = basic_conv2d_forward_nhwc(packed, x, kernel_size=kernel_size,
                                  stride=stride, padding=padding,
                                  out_channels=out_channels,
                                  out_dtype=out_dtype)
    return jnp.transpose(y, (0, 3, 1, 2))


# ----------------------------------------------------------------------------
# Plain-JAX references for correctness checks
# ----------------------------------------------------------------------------
def reference_forward(params, x, *, stride, padding, eps=_BN_EPS):
    """Full-fp32 eval-mode reference (the PyTorch module's semantics)."""
    y = jax.lax.conv_general_dilated(
        x, params['conv_w'], window_strides=(stride, stride),
        padding=[(padding, padding), (padding, padding)],
        dimension_numbers=('NCHW', 'OIHW', 'NCHW'))
    scale = params['gamma'] / jnp.sqrt(params['running_var'] + eps)
    shift = params['beta'] - params['running_mean'] * scale
    y = y * scale[None, :, None, None] + shift[None, :, None, None]
    return jnp.maximum(y, 0.0)


def reference_forward_bf16(params, x, *, stride, padding, eps=_BN_EPS):
    """Reference using the same bf16-input / fp32-accumulate recipe as the
    kernel (BN scale folded into bf16 weights, fp32 bias epilogue)."""
    scale = params['gamma'] / jnp.sqrt(params['running_var'] + eps)
    shift = params['beta'] - params['running_mean'] * scale
    w = (params['conv_w'] * scale[:, None, None, None]).astype(jnp.bfloat16)
    y = jax.lax.conv_general_dilated(
        x.astype(jnp.bfloat16), w, window_strides=(stride, stride),
        padding=[(padding, padding), (padding, padding)],
        dimension_numbers=('NCHW', 'OIHW', 'NCHW'),
        preferred_element_type=jnp.float32)
    y = y + shift[None, :, None, None]
    return jnp.maximum(y, 0.0)


if __name__ == "__main__":
    key = jax.random.PRNGKey(0)
    k_x, k_w = jax.random.split(key)

    INP, OUP, KSIZE, STRIDE, PAD = 4, 32, 3, 1, 1
    x = jax.random.normal(k_x, (2, INP, 16, 16), jnp.float32)
    params = init_params(k_w, INP, OUP, KSIZE)
    packed = pack_params(params, KSIZE)

    fwd = jax.jit(functools.partial(
        basic_conv2d_forward, kernel_size=KSIZE, stride=STRIDE,
        padding=PAD, out_channels=OUP))
    y = jax.block_until_ready(fwd(packed, x))

    assert y.shape == (2, OUP, 16, 16), y.shape
    assert bool(jnp.all(jnp.isfinite(y)))

    # Tight check against a reference that uses the identical bf16-input /
    # fp32-accumulate recipe (only accumulation order differs).
    y_ref_bf16 = reference_forward_bf16(params, x, stride=STRIDE, padding=PAD)
    err_bf16 = float(jnp.max(jnp.abs(y - y_ref_bf16)))
    assert err_bf16 < 2e-3, err_bf16

    # Moderate check against the full-fp32 module semantics; the gap here is
    # the documented bf16 input-rounding of the MXU path.
    y_ref = reference_forward(params, x, stride=STRIDE, padding=PAD)
    err_f32 = float(jnp.max(jnp.abs(y - y_ref)))
    assert err_f32 < 5e-2, err_f32

    print("KERNEL_OK")
</pallas_src>

<mosaic_0001>
module attributes {stable_mosaic.version = 11 : i64} {
  func.func @_conv_bn_relu_kernel(%arg0: i32, %arg1: i32, %arg2: memref<1x18x18x8xbf16, #tpu.memory_space<vmem>>, %arg3: memref<72x128xbf16, #tpu.memory_space<vmem>>, %arg4: memref<1x128xf32, #tpu.memory_space<vmem>>, %arg5: memref<1x256x128xf32, #tpu.memory_space<vmem>>) attributes {dimension_semantics = [#tpu.dimension_semantics<parallel>, #tpu.dimension_semantics<parallel>], iteration_bounds = array<i64: 2, 1>, scalar_prefetch = 0 : i64, scratch_operands = 0 : i64, tpu.core_type = #tpu.core_type<tc>, window_params = [{transform_indices = @transform_0, window_bounds = array<i64: 1, 18, 18, 8>}, {transform_indices = @transform_1, window_bounds = array<i64: 72, 128>}, {transform_indices = @transform_2, window_bounds = array<i64: 1, 128>}, {transform_indices = @transform_3, window_bounds = array<i64: 1, 256, 128>}]} {
    %c0 = arith.constant 0 : index
    %c0_0 = arith.constant 0 : index
    %0 = vector.load %arg4[%c0, %c0_0] : memref<1x128xf32, #tpu.memory_space<vmem>>, vector<1x128xf32>
    %c0_1 = arith.constant 0 : index
    %c0_2 = arith.constant 0 : index
    %c0_3 = arith.constant 0 : index
    %c0_4 = arith.constant 0 : index
    %1 = vector.load %arg2[%c0_1, %c0_2, %c0_3, %c0_4] : memref<1x18x18x8xbf16, #tpu.memory_space<vmem>>, vector<1x16x16x8xbf16>
    %2 = vector.shape_cast %1 : vector<1x16x16x8xbf16> to vector<16x16x8xbf16>
    %c0_5 = arith.constant 0 : index
    %c0_6 = arith.constant 0 : index
    %c1 = arith.constant 1 : index
    %c0_7 = arith.constant 0 : index
    %3 = vector.load %arg2[%c0_5, %c0_6, %c1, %c0_7] : memref<1x18x18x8xbf16, #tpu.memory_space<vmem>>, vector<1x16x16x8xbf16>
    %4 = vector.shape_cast %3 : vector<1x16x16x8xbf16> to vector<16x16x8xbf16>
    %c0_8 = arith.constant 0 : index
    %c0_9 = arith.constant 0 : index
    %c2 = arith.constant 2 : index
    %c0_10 = arith.constant 0 : index
    %5 = vector.load %arg2[%c0_8, %c0_9, %c2, %c0_10] : memref<1x18x18x8xbf16, #tpu.memory_space<vmem>>, vector<1x16x16x8xbf16>
    %6 = vector.shape_cast %5 : vector<1x16x16x8xbf16> to vector<16x16x8xbf16>
    %c0_11 = arith.constant 0 : index
    %c1_12 = arith.constant 1 : index
    %c0_13 = arith.constant 0 : index
    %c0_14 = arith.constant 0 : index
    %7 = vector.load %arg2[%c0_11, %c1_12, %c0_13, %c0_14] : memref<1x18x18x8xbf16, #tpu.memory_space<vmem>>, vector<1x16x16x8xbf16>
    %8 = vector.shape_cast %7 : vector<1x16x16x8xbf16> to vector<16x16x8xbf16>
    %c0_15 = arith.constant 0 : index
    %c1_16 = arith.constant 1 : index
    %c1_17 = arith.constant 1 : index
    %c0_18 = arith.constant 0 : index
    %9 = vector.load %arg2[%c0_15, %c1_16, %c1_17, %c0_18] : memref<1x18x18x8xbf16, #tpu.memory_space<vmem>>, vector<1x16x16x8xbf16>
    %10 = vector.shape_cast %9 : vector<1x16x16x8xbf16> to vector<16x16x8xbf16>
    %c0_19 = arith.constant 0 : index
    %c1_20 = arith.constant 1 : index
    %c2_21 = arith.constant 2 : index
    %c0_22 = arith.constant 0 : index
    %11 = vector.load %arg2[%c0_19, %c1_20, %c2_21, %c0_22] : memref<1x18x18x8xbf16, #tpu.memory_space<vmem>>, vector<1x16x16x8xbf16>
    %12 = vector.shape_cast %11 : vector<1x16x16x8xbf16> to vector<16x16x8xbf16>
    %c0_23 = arith.constant 0 : index
    %c2_24 = arith.constant 2 : index
    %c0_25 = arith.constant 0 : index
    %c0_26 = arith.constant 0 : index
    %13 = vector.load %arg2[%c0_23, %c2_24, %c0_25, %c0_26] : memref<1x18x18x8xbf16, #tpu.memory_space<vmem>>, vector<1x16x16x8xbf16>
    %14 = vector.shape_cast %13 : vector<1x16x16x8xbf16> to vector<16x16x8xbf16>
    %c0_27 = arith.constant 0 : index
    %c2_28 = arith.constant 2 : index
    %c1_29 = arith.constant 1 : index
    %c0_30 = arith.constant 0 : index
    %15 = vector.load %arg2[%c0_27, %c2_28, %c1_29, %c0_30] : memref<1x18x18x8xbf16, #tpu.memory_space<vmem>>, vector<1x16x16x8xbf16>
    %16 = vector.shape_cast %15 : vector<1x16x16x8xbf16> to vector<16x16x8xbf16>
    %c0_31 = arith.constant 0 : index
    %c2_32 = arith.constant 2 : index
    %c2_33 = arith.constant 2 : index
    %c0_34 = arith.constant 0 : index
    %17 = vector.load %arg2[%c0_31, %c2_32, %c2_33, %c0_34] : memref<1x18x18x8xbf16, #tpu.memory_space<vmem>>, vector<1x16x16x8xbf16>
    %18 = vector.shape_cast %17 : vector<1x16x16x8xbf16> to vector<16x16x8xbf16>
    %19 = tpu.concatenate %2, %4, %6, %8, %10, %12, %14, %16, %18 in 2 : vector<16x16x8xbf16>, vector<16x16x8xbf16>, vector<16x16x8xbf16>, vector<16x16x8xbf16>, vector<16x16x8xbf16>, vector<16x16x8xbf16>, vector<16x16x8xbf16>, vector<16x16x8xbf16>, vector<16x16x8xbf16> -> vector<16x16x72xbf16>
    %20 = vector.shape_cast %19 : vector<16x16x72xbf16> to vector<256x72xbf16>
    %c0_35 = arith.constant 0 : index
    %c0_36 = arith.constant 0 : index
    %21 = vector.load %arg3[%c0_35, %c0_36] : memref<72x128xbf16, #tpu.memory_space<vmem>>, vector<72x128xbf16>
    %cst = arith.constant dense<0.000000e+00> : vector<256x128xf32>
    %22 = tpu.matmul %20, %21, %cst {dimension_numbers = #tpu.dot_dimension_numbers<[1], [0], [0], [1], [0, 0, 1, 1], [], []>} : vector<256x72xbf16>, vector<72x128xbf16>, vector<256x128xf32> -> vector<256x128xf32>
    %23 = vector.broadcast %0 : vector<1x128xf32> to vector<256x128xf32>
    %24 = arith.addf %22, %23 : vector<256x128xf32>
    %cst_37 = arith.constant 0.000000e+00 : f32
    %25 = vector.broadcast %cst_37 : f32 to vector<256x128xf32>
    %26 = arith.maximumf %24, %25 : vector<256x128xf32>
    %c0_38 = arith.constant 0 : index
    %c0_39 = arith.constant 0 : index
    %c0_40 = arith.constant 0 : index
    %27 = vector.load %arg5[%c0_38, %c0_39, %c0_40] : memref<1x256x128xf32, #tpu.memory_space<vmem>>, vector<1x256x128xf32>
    %28 = vector.shape_cast %27 : vector<1x256x128xf32> to vector<256x128xf32>
    %29 = vector.shape_cast %26 : vector<256x128xf32> to vector<1x256x128xf32>
    tpu.vector_store %arg5[%c0_38, %c0_39, %c0_40], %29 {strides = array<i32>} : memref<1x256x128xf32, #tpu.memory_space<vmem>>, vector<1x256x128xf32>,
    return
  }
  func.func @transform_0(%arg0: i32, %arg1: i32) -> (i32, i32, i32, i32) {
    %c0_i32 = arith.constant 0 : i32
    %c0_i32_0 = arith.constant 0 : i32
    %c0_i32_1 = arith.constant 0 : i32
    %c0_i32_2 = arith.constant 0 : i32
    return %arg0, %c0_i32, %c0_i32_0, %c0_i32_1 : i32, i32, i32, i32
  }
  func.func @transform_1(%arg0: i32, %arg1: i32) -> (i32, i32) {
    %c0_i32 = arith.constant 0 : i32
    %c0_i32_0 = arith.constant 0 : i32
    return %c0_i32, %arg1 : i32, i32
  }
  func.func @transform_2(%arg0: i32, %arg1: i32) -> (i32, i32) {
    %c0_i32 = arith.constant 0 : i32
    %c0_i32_0 = arith.constant 0 : i32
    return %c0_i32, %arg1 : i32, i32
  }
  func.func @transform_3(%arg0: i32, %arg1: i32) -> (i32, i32, i32) {
    %c0_i32 = arith.constant 0 : i32
    %c0_i32_0 = arith.constant 0 : i32
    return %arg0, %c0_i32, %arg1 : i32, i32, i32
  }
}

</mosaic_0001>

<bundles_post_ra>
// kernel: basic_conv2d_forward.1
= control target key start
LH: loop header
LB: loop body
LE: loop exit
PB: predicated region body
PF: predicated region fallthrough
CT: control target
= control target key end

     0   :  { %8 = vsyncpa [#allocation3], 0  ;;  %s4482_s0 = inlined_call_operand.vmem [shape: bf16[2,18,18,8], index: 0, kind: input, shape index: {}]   ;;  %s4483_s1 = inlined_call_operand.vmem [shape: bf16[72,128], index: 1, kind: input, shape index: {}]   ;;  %s4484_s2 = inlined_call_operand.vmem [shape: f32[1,128], index: 2, kind: input, shape index: {}]   ;;  %s4485_s3 = inlined_call_operand.hbm [shape: f32[2,256,128], index: 3, kind: output, shape index: {}]  }
   0x1   :  { %10 = vsyncpa [#allocation3 + $0x1], 0  ;;  %s3162_s12 = smov 0   ;;  %s3164_s13 = smov 0  }
   0x2   :  { %s3166_s14 = smov 0   ;;  %s3168_s15 = smov 0  }
   0x3   :  { %s3170_s16 = smov 0   ;;  %s3172_s17 = smov 0  }
   0x4 LB: > { %s2525_s18 = sadd.s32 4294967295, %s3131_s17   ;;  %s2526_s19 = sadd.s32 4294967294, %s3131_s17   ;;  %s3131_s17 = sphi %s3172_s17, %s16_s17   ;;  %s3127_s16 = sphi %s3170_s16, %s4498_s16   ;;  %s3123_s15 = sphi %s3168_s15, %s4497_s15   ;;  %s3119_s14 = sphi %s3166_s14, %s4496_s14   ;;  %s3115_s13 = sphi %s3164_s13, %s4495_s13   ;;  %s3111_s12 = sphi %s3162_s12, %s4494_s12  }
   0x5   : > { %s28_s20 = sadd.s32 1, %s3127_s16  ;;  %s115_s21 = sadd.s32 1, %s3119_s14 }
   0x6   : > { %p30_p0 = scmp.ge.s32.totalorder %s28_s20, 2  ;;  %p125_p1 = scmp.ne.s32.totalorder %s3119_s14, %s3115_s13 }
   0x7   : > { %p126_p2 = scmp.eq.s32.totalorder %s2525_s18, 1  ;;  %p131_p3 = scmp.ne.s32.totalorder %s3115_s13, %s3111_s12 }
   0x8   : > { %s4500_s20 = smov (%p30_p0, %s28_s20), 0  ;;  %p132_p5 = scmp.eq.s32.totalorder %s2526_s19, 1 }
   0x9   : > { %p3202_p4 = por %p126_p2, %p125_p1  ;;  %s110_s23 = ssub.s32 %s3127_s16, %s4500_s20 }
   0xa   : > { %p2531_p6 = scmp.ge.s32.totalorder %s3131_s17, 1  ;;  %p113_p7 = scmp.eq.s32.totalorder %s110_s23, 0 }
   0xb   : > { %p3209_p8 = por %p132_p5, %p131_p3  ;;  %p171_p9 = scmp.lt.s32.totalorder %s3131_s17, 3 }
   0xc   : > { %s3215_s25 = scalar_select %p113_p7, %s3119_s14, %s115_s21  }
   0xd   : > { %p172_p10 = pnand %p2531_p6, %p171_p9 }
   0xf   : > { %175 = sbr.rel (%p172_p10) target bundleno = 633 (0x279), region = 32 }
  0x14   : > { %p202_p11 = scmp.lt.s32.totalorder %s3123_s15, 1  ;;  %vm538_vm0 = vsmask.f32 7424  ;;  %s3133_s4 = smov 8   ;;  %vm811_vm1 = vcmask 1046528   ;;  %vm1916_vm2 = vcmask 64512  }
  0x15   : > { %s3134_s5 = smov 16   ;;  %s3135_s6 = smov 24   ;;  %vm1949_vm3 = vcmask 130048   ;;  %vm1982_vm4 = vcmask 195584   ;;  %vm2252_vm5 = vcmask 1043456   ;;  %vm2015_vm6 = vcmask 261120  }
  0x16   : > { %s203_s26 = scalar_select %p202_p11, %s3123_s15, 1  ;;  %vm2048_vm7 = vcmask 326656   ;;  %vm2081_vm8 = vcmask 392192   ;;  %vm2114_vm9 = vcmask 457728   ;;  %vm2147_vm10 = vcmask 523264  }
  0x17   : > { %s3136_s7 = smov 32   ;;  %s3137_s8 = smov 48   ;;  %vm2219_vm11 = vcmask 588800  }
  0x18   : > { %s2910_s27 = smul.u32 216, %s203_s26  ;;  %s3138_s9 = smov 40  }
  0x19   : > { %s3139_s10 = smov 56   ;;  %s3140_s11 = smov 64  }
  0x1a   : > { %s3222_s30 = scalar_lea.vmem %s4482_s0, %s2910_s27 }
  0x1b   : > { %v3225_v0 = vld [vmem:[%s3222_s30 + $0x30] sm:$0xff]   ;;  %v252_v1 = vld [vmem:[%s3222_s30 + $0x38] sm:$0x1]  ;;  %v250_v6 = vld [vmem:[%s3222_s30 + $0x20] sm:$0x1] }
  0x1c   : > { %v3229_v2 = vld [vmem:[%s3222_s30 + $0x18] sm:$0xff]   ;;  %v510_v3 = vunpack.c.l.b16 %v252_v1  ;;  %v588_v4 = vshrl.u32 %v3225_v0, 16  ;;  %v590_v5 = vshll.u32 %v3225_v0, 16  ;;  %v2705_v8 = vld [vmem:[%s3222_s30] sm:$0xff]   ;;  %v508_v9 = vunpack.c.l.b16 %v250_v6  ;;  %v248_v11 = vld [vmem:[%s3222_s30 + $0x8] sm:$0x1] }
  0x1d   : > { %v564_v7 = vshrl.u32 %v3229_v2, 16  ;;  %v566_v10 = vshll.u32 %v3229_v2, 16  ;;  %v540_v12 = vshrl.u32 %v2705_v8, 16  ;;  %v542_v13 = vshll.u32 %v2705_v8, 16  ;;  %v3239_v14 = vld [vmem:[%s3222_s30 + $0x60] sm:$0xff]   ;;  %v3269_v42 = vld [vmem:[%s3222_s30 + $0x48] sm:$0xff]  }
  0x1e   : > { %v3241_v15 = vpack.c.b16 %v510_v3, %v510_v3  ;;  %v592_v16 = vrot.slane %v590_v5, 1  ;;  %v506_v17 = vunpack.c.l.b16 %v248_v11  ;;  %v256_v18 = vld [vmem:[%s3222_s30 + $0x68] sm:$0x1]  ;;  %v636_v19 = vshrl.u32 %v3239_v14, 16  ;;  %v251_v30 = vld [vmem:[%s3222_s30 + $0x2c] sm:$0x1] }
  0x1f   : > { %v3245_v20 = vpack.c.b16 %v508_v9, %v508_v9  ;;  %v568_v21 = vrot.slane %v566_v10, 1  ;;  %v544_v22 = vrot.slane %v542_v13, 1  ;;  %v514_v23 = vunpack.c.l.b16 %v256_v18  ;;  %v3248_v24 = vld [vmem:[%s3222_s30 + $0x24] sm:$0xff]   ;;  %v254_v35 = vld [vmem:[%s3222_s30 + $0x50] sm:$0x1]  ;;  %v3281_v50 = vld [vmem:[%s3222_s30 + $0x3c] sm:$0xff]  }
  0x20   : > { %v3251_v25 = vld [vmem:[%s3222_s30 + $0x24] sm:$0xf0]  ;;  %v3253_v26 = vor.u32 %v592_v16, %v588_v4  ;;  %v595_v27 = vshll.u32 %v3241_v15, 16  ;;  %v3256_v28 = vpack.c.b16 %v506_v17, %v506_v17  ;;  %v638_v29 = vshll.u32 %v3239_v14, 16  ;;  %v3284_v51 = vld [vmem:[%s3222_s30 + $0x3c] sm:$0xf0] }
  0x21   : > { %v3260_v31 = vor.u32 %v568_v21, %v564_v7  ;;  %v571_v32 = vshll.u32 %v3245_v20, 16  ;;  %v545_v33 = vor.u32 %v544_v22, %v540_v12  ;;  %v3263_v34 = vpack.c.b16 %v514_v23, %v514_v23  ;;  %v253_v56 = vld [vmem:[%s3222_s30 + $0x44] sm:$0x1]  ;;  %v3294_v57 = vld [vmem:[%s3222_s30 + $0x54] sm:$0xff]   ;;  %v255_v3 = vld [vmem:[%s3222_s30 + $0x5c] sm:$0x1] }
  0x22   : > { %4490 = vst [vmem:[#allocation5_spill] sm:$0xff] %v3253_v26  ;;  %v597_v36 = vrot.slane %v595_v27, 1  ;;  %v547_v37 = vshll.u32 %v3256_v28, 16  ;;  %v640_v38 = vrot.slane %v638_v29, 1  ;;  %v509_v41 = vunpack.c.l.b16 %v251_v30  ;;  %v3297_v58 = vld [vmem:[%s3222_s30 + $0x54] sm:$0xf0] }
  0x23   : > { %v573_v39 = vrot.slane %v571_v32, 1  ;;  %v643_v40 = vshll.u32 %v3263_v34, 16  ;;  %v512_v46 = vunpack.c.l.b16 %v254_v35  ;;  %v612_v54 = vshrl.u32 %v3269_v42, 16  ;;  %v3308_v4 = vld [vmem:[%s3222_s30 + $0xc] sm:$0xff]   ;;  %v249_v16 = vld [vmem:[%s3222_s30 + $0x14] sm:$0x1] }
  0x24   : > { %v598_v43 = vsel %vm538_vm0, %v3253_v26, %v597_v36  ;;  %v549_v44 = vrot.slane %v547_v37, 1  ;;  %v3273_v45 = vor.u32 %v640_v38, %v636_v19  ;;  %v3278_v49 = vpack.c.b16 %v509_v41, %v509_v41  ;;  %v3311_v5 = vld [vmem:[%s3222_s30 + $0xc] sm:$0xf0]  ;;  %v3323_v21 = vld [vmem:[%s3222_s30 + $0x84] sm:$0xff]   ;;  %v259_v36 = vld [vmem:[%s3222_s30 + $0x8c] sm:$0x1] }
  0x25   : > { %739 = vrot.lane.b32.xlu2 %v598_v43, %s3133_s4  ;;  %v574_v47 = vsel %vm538_vm0, %v3260_v31, %v573_v39  ;;  %v645_v48 = vrot.slane %v643_v40, 1  ;;  %v3288_v53 = vpack.c.b16 %v512_v46, %v512_v46  ;;  %v614_v55 = vshll.u32 %v3269_v42, 16  ;;  %v3326_v22 = vld [vmem:[%s3222_s30 + $0x84] sm:$0xf0]  ;;  %v258_v43 = vld [vmem:[%s3222_s30 + $0x80] sm:$0x1] }
  0x26   : > { %4491 = vst [vmem:[#allocation6_spill] sm:$0xff] %v3273_v45  ;;  %735 = vrot.lane.b32.xlu1 %v574_v47, %s3133_s4  ;;  %v550_v52 = vsel %vm538_vm0, %v545_v33, %v549_v44  ;;  %v576_v60 = vshrl.u32 %v3248_v24, 16  ;;  %v578_v61 = vshll.u32 %v3248_v24, 16  ;;  %v583_v62 = vshll.u32 %v3278_v49, 16 }
  0x27   : > { %731 = vrot.lane.b32.xlu0 %v550_v52, %s3133_s4  ;;  %v646_v59 = vsel %vm538_vm0, %v3273_v45, %v645_v48  ;;  %v616_v63 = vrot.slane %v614_v55, 1  ;;  %v619_v1 = vshll.u32 %v3288_v53, 16  ;;  %v511_v8 = vunpack.c.l.b16 %v253_v56  ;;  %v3347_v56 = vld [vmem:[%s3222_s30 + $0x78] sm:$0xff]   ;;  %v2985_v45 = vld [vmem:[%s3222_s30 + $0x24] sm:$0xe] }
  0x28   : > { %v580_v6 = vrot.slane %v578_v61, 1  ;;  %v585_v7 = vrot.slane %v583_v62, 1  ;;  %v513_v13 = vunpack.c.l.b16 %v255_v3  ;;  %v600_v18 = vshrl.u32 %v3281_v50, 16  ;;  %v257_v3 = vld [vmem:[%s3222_s30 + $0x74] sm:$0x1] }
  0x29   : > { %v3313_v9 = vor.u32 %v616_v63, %v612_v54  ;;  %v621_v10 = vrot.slane %v619_v1, 1  ;;  %v3315_v12 = vpack.c.b16 %v511_v8, %v511_v8  ;;  %v602_v19 = vshll.u32 %v3281_v50, 16  ;;  %v3353_v63 = vld [vmem:[%s3222_s30 + $0x6c] sm:$0xff]  }
  0x2a   : > { %v581_v11 = vor.u32 %v580_v6, %v576_v60  ;;  %v3331_v29 = vpack.c.b16 %v513_v13, %v513_v13  ;;  %v624_v32 = vshrl.u32 %v3294_v57, 16  ;;  %v626_v33 = vshll.u32 %v3294_v57, 16  ;;  %v3356_v1 = vld [vmem:[%s3222_s30 + $0x6c] sm:$0xf0] }
  0x2b   : > { %v622_v17 = vsel %vm538_vm0, %v3313_v9, %v621_v10  ;;  %v607_v27 = vshll.u32 %v3315_v12, 16  ;;  %v604_v30 = vrot.slane %v602_v19, 1  ;;  %v507_v35 = vunpack.c.l.b16 %v249_v16 }
  0x2c   : > { %v586_v23 = vsel %vm538_vm0, %v581_v11, %v585_v7  ;;  %v631_v38 = vshll.u32 %v3331_v29, 16  ;;  %v628_v40 = vrot.slane %v626_v33, 1  ;;  %v552_v46 = vshrl.u32 %v3308_v4, 16 }
  0x2d   : > { %747 = vrot.lane.b32.xlu2 %v646_v59, %s3133_s4  ;;  %v609_v37 = vrot.slane %v607_v27, 1  ;;  %v605_v39 = vor.u32 %v604_v30, %v600_v18  ;;  %v3339_v41 = vpack.c.b16 %v507_v35, %v507_v35  ;;  %v554_v47 = vshll.u32 %v3308_v4, 16  ;;  %v262_v18 = vld [vmem:[%s3222_s30 + $0xb0] sm:$0x1]  ;;  %v3370_v27 = vld [vmem:[%s3222_s30 + $0xa8] sm:$0xff]  }
  0x2e   : > { %737 = vrot.lane.b32.xlu1 %v586_v23, %s3133_s4  ;;  %v633_v44 = vrot.slane %v631_v38, 1  ;;  %v517_v48 = vunpack.c.l.b16 %v259_v36  ;;  %v629_v54 = vor.u32 %v628_v40, %v624_v32  ;;  %v516_v61 = vunpack.c.l.b16 %v258_v43  ;;  %v3381_v40 = vld [vmem:[%s3222_s30 + $0x9c] sm:$0xf0] }
  0x2f   : > { %743 = vrot.lane.b32.xlu0 %v622_v17, %s3133_s4  ;;  %v610_v52 = vsel %vm538_vm0, %v605_v39, %v609_v37  ;;  %v559_v55 = vshll.u32 %v3339_v41, 16  ;;  %v556_v59 = vrot.slane %v554_v47, 1  ;;  %v660_v62 = vshrl.u32 %v3347_v56, 16  ;;  %v3378_v39 = vld [vmem:[%s3222_s30 + $0x9c] sm:$0xff]  }
  0x30   : > { %v3349_v60 = vpack.c.b16 %v517_v48, %v517_v48  ;;  %v634_v6 = vsel %vm538_vm0, %v629_v54, %v633_v44  ;;  %v672_v8 = vshrl.u32 %v3323_v21, 16  ;;  %v674_v10 = vshll.u32 %v3323_v21, 16  ;;  %v261_v48 = vld [vmem:[%s3222_s30 + $0xa4] sm:$0x1] }
  0x31   : > { %v561_v7 = vrot.slane %v559_v55, 1  ;;  %v557_v11 = vor.u32 %v556_v59, %v552_v46  ;;  %v3364_v16 = vpack.c.b16 %v516_v61, %v516_v61  ;;  %v662_v17 = vshll.u32 %v3347_v56, 16  ;;  %v260_v61 = vld [vmem:[%s3222_s30 + $0x98] sm:$0x1] }
  0x32   : > { %v679_v13 = vshll.u32 %v3349_v60, 16  ;;  %v676_v19 = vrot.slane %v674_v10, 1  ;;  %v515_v23 = vunpack.c.l.b16 %v257_v3  ;;  %v520_v38 = vunpack.c.l.b16 %v262_v18 }
  0x33   : > { %v562_v30 = vsel %vm538_vm0, %v557_v11, %v561_v7  ;;  %v664_v33 = vrot.slane %v662_v17, 1  ;;  %v667_v35 = vshll.u32 %v3364_v16, 16  ;;  %v708_v46 = vshrl.u32 %v3370_v27, 16  ;;  %v3398_v7 = vld [vmem:[%s3222_s30 + $0x90] sm:$0xff]  }
  0x34   : > { %v681_v32 = vrot.slane %v679_v13, 1  ;;  %v677_v36 = vor.u32 %v676_v19, %v672_v8  ;;  %v3375_v37 = vpack.c.b16 %v515_v23, %v515_v23  ;;  %v710_v47 = vshll.u32 %v3370_v27, 16  ;;  %v2982_v13 = vld [vmem:[%s3222_s30 + $0xc] sm:$0xe] }
  0x35   : > { %741 = vrot.lane.b32.xlu2 %v610_v52, %s3133_s4  ;;  %v3383_v43 = vor.u32 %v664_v33, %v660_v62  ;;  %v669_v44 = vrot.slane %v667_v35, 1  ;;  %v648_v54 = vshrl.u32 %v3353_v63, 16  ;;  %v650_v55 = vshll.u32 %v3353_v63, 16 }
  0x36   : > { %745 = vrot.lane.b32.xlu1 %v634_v6, %s3133_s4  ;;  %v682_v52 = vsel %vm538_vm0, %v677_v36, %v681_v32  ;;  %v655_v59 = vshll.u32 %v3375_v37, 16  ;;  %v3395_v3 = vpack.c.b16 %v520_v38, %v520_v38  ;;  %v712_v6 = vrot.slane %v710_v47, 1 }
  0x37   : > { %733 = vrot.lane.b32.xlu0 %v562_v30, %s3133_s4  ;;  %v670_v62 = vsel %vm538_vm0, %v3383_v43, %v669_v44  ;;  %v652_v8 = vrot.slane %v650_v55, 1  ;;  %v519_v11 = vunpack.c.l.b16 %v261_v48  ;;  %v518_v19 = vunpack.c.l.b16 %v260_v61  ;;  %v3417_v48 = vld [vmem:[%s3222_s30 + $0xb4] sm:$0xff]   ;;  %v2824_v61 = vld [vmem:[%s3222_s30] sm:$0xe] }
  0x38   : > { %v657_v10 = vrot.slane %v655_v59, 1  ;;  %v3402_v17 = vor.u32 %v712_v6, %v708_v46  ;;  %v715_v18 = vshll.u32 %v3395_v3, 16  ;;  %v686_v32 = vshll.u32 %v3398_v7, 16  ;;  %v2823_v59 = vld [vmem:[%s3222_s30] sm:$0xf0] }
  0x39   : > { %v653_v23 = vor.u32 %v652_v8, %v648_v54  ;;  %v3406_v30 = vpack.c.b16 %v519_v11, %v519_v11  ;;  %v3409_v35 = vpack.c.b16 %v518_v19, %v518_v19  ;;  %v684_v36 = vshrl.u32 %v3398_v7, 16  ;;  %v263_v11 = vld [vmem:[%s3222_s30 + $0xbc] sm:$0x1] }
  0x3a   : > { %v717_v33 = vrot.slane %v715_v18, 1  ;;  %v696_v44 = vshrl.u32 %v3378_v39, 16  ;;  %v698_v46 = vshll.u32 %v3378_v39, 16  ;;  %v688_v54 = vrot.slane %v686_v32, 1 }
  0x3b   : > { %v658_v38 = vsel %vm538_vm0, %v653_v23, %v657_v10  ;;  %v703_v47 = vshll.u32 %v3406_v30, 16  ;;  %v691_v55 = vshll.u32 %v3409_v35, 16  ;;  %v2983_v10 = vor.u32 %v2982_v13, %v3311_v5 }
  0x3c   : > { %v700_v6 = vrot.slane %v698_v46, 1  ;;  %v3430_v18 = vor.u32 %v688_v54, %v684_v36  ;;  %v2825_v32 = vor.u32 %v2824_v61, %v2823_v59  ;;  %v521_v26 = vunpack.c.l.b16 %v263_v11 }
  0x3d   : > { %753 = vrot.lane.b32.xlu2 %v682_v52, %s3133_s4  ;;  %v3420_v52 = vld [vmem:[%s3222_s30 + $0xb4] sm:$0xf0]  ;;  %v705_v8 = vrot.slane %v703_v47, 1  ;;  %v693_v19 = vrot.slane %v691_v55, 1  ;;  %v815_v5 = vrot.slane %v2983_v10, 1  ;;  %v813_v13 = vrot.slane %v3256_v28, 1 }
  0x3e   : > { %751 = vrot.lane.b32.xlu1 %v670_v62, %s3133_s4  ;;  %v718_v62 = vsel %vm538_vm0, %v3402_v17, %v717_v33  ;;  %v701_v23 = vor.u32 %v700_v6, %v696_v44  ;;  %v3440_v36 = vpack.c.b16 %v521_v26, %v521_v26  ;;  %v2829_v44 = vld [vmem:[%s3222_s30 + $0x30] sm:$0xf0]  ;;  %v812_v47 = vrot.slane %v2825_v32, 1  ;;  %v2827_v26 = vld [vmem:[%s3222_s30 + $0x18] sm:$0xe] }
  0x3f   : > { %749 = vrot.lane.b32.xlu0 %v658_v38, %s3133_s4  ;;  %v816_v38 = vrot.slane %v3339_v41, 1  ;;  %v694_v46 = vsel %vm538_vm0, %v3430_v18, %v693_v19  ;;  %v2830_v41 = vld [vmem:[%s3222_s30 + $0x30] sm:$0xe]  ;;  %v720_v54 = vshrl.u32 %v3417_v48, 16  ;;  %v722_v55 = vshll.u32 %v3417_v48, 16 }
  0x40   : > { %v706_v33 = vsel %vm538_vm0, %v701_v23, %v705_v8  ;;  %v727_v59 = vshll.u32 %v3440_v36, 16  ;;  %v2831_v6 = vor.u32 %v2830_v41, %v2829_v44  ;;  %v2826_v8 = vld [vmem:[%s3222_s30 + $0x18] sm:$0xf0]  ;;  %v2988_v10 = vld [vmem:[%s3222_s30 + $0x54] sm:$0xe]  ;;  %v814_v11 = vsel %vm811_vm1, %v812_v47, %v813_v13 }
  0x41   : > { %v817_v61 = vsel %vm811_vm1, %v815_v5, %v816_v38  ;;  %v2986_v23 = vor.u32 %v2985_v45, %v3251_v25  ;;  %v825_v32 = vrot.slane %v3241_v15, 1  ;;  %v2991_v5 = vld [vmem:[%s3222_s30 + $0x3c] sm:$0xe]  ;;  %v822_v13 = vrot.slane %v3278_v49, 1  ;;  %v2832_v45 = vld [vmem:[%s3222_s30 + $0x48] sm:$0xf0] }
  0x42   : > { %v729_v28 = vrot.slane %v727_v59, 1  ;;  %v819_v25 = vrot.slane %v3245_v20, 1  ;;  %v2833_v41 = vld [vmem:[%s3222_s30 + $0x48] sm:$0xe]  ;;  %v2994_v49 = vld [vmem:[%s3222_s30 + $0x6c] sm:$0xe] }
  0x43   : > { %v821_v44 = vrot.slane %v2986_v23, 1  ;;  %v2834_v59 = vor.u32 %v2833_v41, %v2832_v45  ;;  %v837_v45 = vrot.slane %v3263_v34, 1  ;;  %v2842_v41 = vld [vmem:[%s3222_s30 + $0x90] sm:$0xe] }
  0x45   : > { %759 = vrot.lane.b32.xlu2 %v718_v62, %s3133_s4  ;;  %v724_v62 = vrot.slane %v722_v55, 1  ;;  %v823_v55 = vsel %vm811_vm1, %v821_v44, %v822_v13 }
  0x46   : > { %757 = vrot.lane.b32.xlu1 %v706_v33, %s3133_s4  ;;  %v824_v33 = vrot.slane %v2831_v6, 1  ;;  %v2992_v6 = vor.u32 %v2991_v5, %v3284_v51  ;;  %v2997_v51 = vld [vmem:[%s3222_s30 + $0x9c] sm:$0xe] }
  0x47   : > { %755 = vrot.lane.b32.xlu0 %v694_v46, %s3133_s4  ;;  %v725_v19 = vor.u32 %v724_v62, %v720_v54  ;;  %v2828_v46 = vor.u32 %v2827_v26, %v2826_v8  ;;  %v2989_v54 = vor.u32 %v2988_v10, %v3297_v58  ;;  %v834_v62 = vrot.slane %v3331_v29, 1  ;;  %v2838_v8 = vld [vmem:[%s3222_s30 + $0x78] sm:$0xf0]  ;;  %v2839_v58 = vld [vmem:[%s3222_s30 + $0x78] sm:$0xe] }
  0x48   : > { %v826_v15 = vsel %vm811_vm1, %v824_v33, %v825_v32  ;;  %v831_v26 = vrot.slane %v3288_v53, 1  ;;  %v2840_v23 = vor.u32 %v2839_v58, %v2838_v8  ;;  %v2835_v32 = vld [vmem:[%s3222_s30 + $0x60] sm:$0xf0]  ;;  %v2836_v29 = vld [vmem:[%s3222_s30 + $0x60] sm:$0xe]  ;;  %v2995_v33 = vor.u32 %v2994_v49, %v3356_v1  ;;  %v3508_v58 = vld [vmem:[%s3222_s30 + $0xc] sm:$0xff]  }
  0x49   : > { %v730_v38 = vsel %vm538_vm0, %v725_v19, %v729_v28  ;;  %v818_v47 = vrot.slane %v2828_v46, 1  ;;  %v833_v20 = vrot.slane %v2989_v54, 1  ;;  %v830_v28 = vrot.slane %v2834_v59, 1  ;;  %v2841_v1 = vld [vmem:[%s3222_s30 + $0x90] sm:$0xf0] }
  0x4a   : > { %v828_v19 = vrot.slane %v3315_v12, 1  ;;  %v843_v53 = vrot.slane %v3364_v16, 1  ;;  %v842_v5 = vrot.slane %v2840_v23, 1  ;;  %v2837_v44 = vor.u32 %v2836_v29, %v2835_v32  ;;  %v3000_v12 = vld [vmem:[%s3222_s30 + $0x84] sm:$0xe] }
  0x4b   : > { %v835_v10 = vsel %vm811_vm1, %v833_v20, %v834_v62  ;;  %v839_v13 = vrot.slane %v2995_v33, 1  ;;  %v852_v49 = vrot.slane %v3406_v30, 1  ;;  %v849_v20 = vrot.slane %v3409_v35, 1  ;;  %v2844_v30 = vld [vmem:[%s3222_s30 + $0xa8] sm:$0xf0]  ;;  %v3525_v29 = vld [vmem:[%s3222_s30 + $0x24] sm:$0xff]  }
  0x4c   : > { %v836_v16 = vrot.slane %v2837_v44, 1  ;;  %v846_v8 = vrot.slane %v3349_v60, 1  ;;  %v855_v32 = vrot.slane %v3395_v3, 1  ;;  %v3536_v3 = vld [vmem:[%s3222_s30 + $0x54] sm:$0xff]   ;;  %v3544_v33 = vld [vmem:[%s3222_s30 + $0x3c] sm:$0xff]  }
  0x4d   : > { %862 = vrot.lane.b32.xlu2 %v817_v61, %s3134_s5  ;;  %v820_v61 = vsel %vm811_vm1, %v818_v47, %v819_v25  ;;  %v840_v25 = vrot.slane %v3375_v37, 1  ;;  %v2998_v47 = vor.u32 %v2997_v51, %v3381_v40  ;;  %v3003_v37 = vld [vmem:[%s3222_s30 + $0xb4] sm:$0xe]  ;;  %v3528_v51 = vld [vmem:[%s3222_s30 + $0x24] sm:$0xf0] }
  0x4e   : > { %860 = vrot.lane.b32.xlu1 %v814_v11, %s3134_s5  ;;  %v827_v11 = vrot.slane %v2992_v6, 1  ;;  %v838_v59 = vsel %vm811_vm1, %v836_v16, %v837_v45  ;;  %v3557_v44 = vld [vmem:[%s3222_s30 + $0x6c] sm:$0xf0]  ;;  %v3577_v45 = vld [vmem:[%s3222_s30 + $0x84] sm:$0xf0] }
  0x4f   : > { %761 = vrot.lane.b32.xlu0 %v730_v38, %s3133_s4  ;;  %v832_v38 = vsel %vm811_vm1, %v830_v28, %v831_v26  ;;  %v841_v54 = vsel %vm811_vm1, %v839_v13, %v840_v25  ;;  %v851_v34 = vrot.slane %v2998_v47, 1  ;;  %v3511_v28 = vld [vmem:[%s3222_s30 + $0xc] sm:$0xf0]  ;;  %v2558_v13 = vld [vmem:[%s3222_s30 + $0x9c] sm:$0xff]   ;;  %v3574_v25 = vld [vmem:[%s3222_s30 + $0x84] sm:$0xff]  }
  0x50   : > { %v829_v46 = vsel %vm811_vm1, %v827_v11, %v828_v19  ;;  %v858_v19 = vrot.slane %v3440_v36, 1  ;;  %v2566_v16 = vld [vmem:[%s3222_s30 + $0x14] sm:$0x1] }
  0x51   : > { %v853_v62 = vsel %vm811_vm1, %v851_v34, %v852_v49  ;;  %v3588_v47 = vld [vmem:[%s3222_s30 + $0xb4] sm:$0xff]   ;;  %v1020_v34 = vunpack.c.l.b16 %v2566_v16 }
  0x55   : > { %868 = vrot.lane.b32.xlu2 %v826_v15, %s3134_s5  ;;  %v844_v15 = vsel %vm811_vm1, %v842_v5, %v843_v53  ;;  %v3547_v53 = vld [vmem:[%s3222_s30 + $0x3c] sm:$0xf0]  ;;  %v2550_v5 = vld [vmem:[%s3222_s30 + $0x6c] sm:$0xff]  }
  0x56   : > { %866 = vrot.lane.b32.xlu1 %v823_v55, %s3134_s5  ;;  %v2843_v55 = vor.u32 %v2842_v41, %v2841_v1  ;;  %v2574_v41 = vld [vmem:[%s3222_s30 + $0x74] sm:$0x1] }
  0x57   : > { %864 = vrot.lane.b32.xlu0 %v820_v61, %s3134_s5  ;;  %v3001_v61 = vor.u32 %v3000_v12, %v3326_v22  ;;  %v2845_v22 = vld [vmem:[%s3222_s30 + $0xa8] sm:$0xe] }
  0x58   : > { %v848_v40 = vrot.slane %v2843_v55, 1  ;;  %v2846_v11 = vor.u32 %v2845_v22, %v2844_v30  ;;  %v1028_v55 = vunpack.c.l.b16 %v2574_v41 }
  0x59   : > { %v845_v6 = vrot.slane %v3001_v61, 1 }
  0x5a   : > { %v850_v26 = vsel %vm811_vm1, %v848_v40, %v849_v20  ;;  %v854_v23 = vrot.slane %v2846_v11, 1  ;;  %v3602_v40 = vpack.c.b16 %v1028_v55, %v1028_v55  ;;  %v1055_v20 = vshll.u32 %v3508_v58, 16 }
  0x5b   : > { %v847_v35 = vsel %vm811_vm1, %v845_v6, %v846_v8  ;;  %v3610_v6 = vld [vmem:[%s3222_s30 + $0xc0] sm:$0xff]   ;;  %v1197_v8 = vshrl.u32 %v2558_v13, 16 }
  0x5c   : > { %v856_v36 = vsel %vm811_vm1, %v854_v23, %v855_v32  ;;  %v1156_v11 = vshll.u32 %v3602_v40, 16  ;;  %v3006_v23 = vld [vmem:[%s3222_s30 + $0x9c] sm:$0xe] }
  0x5d   : > { %874 = vrot.lane.b32.xlu2 %v835_v10, %s3134_s5  ;;  %v3004_v10 = vor.u32 %v3003_v37, %v3420_v52  ;;  %v1199_v37 = vshll.u32 %v2558_v13, 16 }
  0x5e   : > { %872 = vrot.lane.b32.xlu1 %v832_v38, %s3134_s5  ;;  %v3539_v38 = vld [vmem:[%s3222_s30 + $0x54] sm:$0xf0]  ;;  %v1158_v16 = vrot.slane %v1156_v11, 1 }
  0x5f   : > { %870 = vrot.lane.b32.xlu0 %v829_v46, %s3134_s5  ;;  %v857_v60 = vrot.slane %v3004_v10, 1  ;;  %v1201_v30 = vrot.slane %v1199_v37, 1  ;;  %v1149_v10 = vshrl.u32 %v2550_v5, 16  ;;  %v2638_v37 = vld [vmem:[%s3222_s30 + $0x80] sm:$0x1] }
  0x61   : > { %v859_v52 = vsel %vm811_vm1, %v857_v60, %v858_v19  ;;  %v1053_v60 = vshrl.u32 %v3508_v58, 16  ;;  %v1057_v19 = vrot.slane %v1055_v20, 1  ;;  %v1202_v32 = vor.u32 %v1201_v30, %v1197_v8 }
  0x63   : > { %v1058_v55 = vor.u32 %v1057_v19, %v1053_v60  ;;  %v2570_v19 = vld [vmem:[%s3222_s30 + $0x44] sm:$0x1] }
  0x65   : > { %880 = vrot.lane.b32.xlu2 %v844_v15, %s3134_s5 }
  0x66   : > { %878 = vrot.lane.b32.xlu1 %v841_v54, %s3134_s5  ;;  %v3591_v54 = vld [vmem:[%s3222_s30 + $0xb4] sm:$0xf0] }
  0x67   : > { %876 = vrot.lane.b32.xlu0 %v838_v59, %s3134_s5 }
  0x6d   : > { %886 = vrot.lane.b32.xlu2 %v853_v62, %s3134_s5 }
  0x6e   : > { %884 = vrot.lane.b32.xlu1 %v850_v26, %s3134_s5  ;;  %v3613_v26 = vpack.c.b16 %v1020_v34, %v1020_v34 }
  0x6f   : > { %882 = vrot.lane.b32.xlu0 %v847_v35, %s3134_s5 }
  0x75   : > { %972 = vrot.lane.b32.xlu2 %v3508_v58, %s3135_s6 }
  0x76   : > { %890 = vrot.lane.b32.xlu1 %v859_v52, %s3134_s5 }
  0x77   : > { %888 = vrot.lane.b32.xlu0 %v856_v36, %s3134_s5  ;;  %v1060_v36 = vshll.u32 %v3613_v26, 16 }
  0x7d   : > { %978 = vrot.lane.b32.xlu2 %v3225_v0, %s3135_s6 }
  0x7e   : > { %976 = vrot.lane.b32.xlu1 %v3525_v29, %s3135_s6 }
  0x7f   : > { %v3551_v46 = vpop.permute.xlu2 %739  ;;  %974 = vrot.lane.b32.xlu0 %v3229_v2, %s3135_s6  ;;  %v3569_v2 = vld [vmem:[%s3222_s30 + $0x9c] sm:$0xf0] }
  0x80   : > { %v3007_v30 = vor.u32 %v3006_v23, %v3569_v2 }
  0x85   : > { %984 = vrot.lane.b32.xlu2 %v3536_v3, %s3135_s6 }
  0x86   : > { %982 = vrot.lane.b32.xlu1 %v3269_v42, %s3135_s6  ;;  %v2578_v42 = vld [vmem:[%s3222_s30 + $0xa4] sm:$0x1] }
  0x87   : > { %v3563_v12 = vpop.permute.xlu2 %747  ;;  %980 = vrot.lane.b32.xlu0 %v3544_v33, %s3135_s6  ;;  %v1032_v15 = vunpack.c.l.b16 %v2578_v42  ;;  %v2642_v42 = vld [vmem:[%s3222_s30 + $0xb0] sm:$0x1] }
  0x88   : > { %v1544_v20 = vunpack.c.l.b16 %v2642_v42 }
  0x89   : > { %v3594_v59 = vpack.c.b16 %v1032_v15, %v1032_v15 }
  0x8a   : > { %v3640_v11 = vpack.c.b16 %v1544_v20, %v1544_v20 }
  0x8b   : > { %v1204_v22 = vshll.u32 %v3594_v59, 16 }
  0x8d   : > { %990 = vrot.lane.b32.xlu2 %v3347_v56, %s3135_s6  ;;  %v1206_v52 = vrot.slane %v1204_v22, 1  ;;  %v1540_v22 = vunpack.c.l.b16 %v2638_v37 }
  0x8e   : > { %988 = vrot.lane.b32.xlu1 %v2550_v5, %s3135_s6 }
  0x8f   : > { %v3580_v1 = vpop.permute.xlu2 %741  ;;  %986 = vrot.lane.b32.xlu0 %v3239_v14, %s3135_s6  ;;  %v1151_v14 = vshll.u32 %v2550_v5, 16  ;;  %v3009_v5 = vld [vmem:[%s3222_s30 + $0x6c] sm:$0xe]  ;;  %v1207_v34 = vsel %vm538_vm0, %v1202_v32, %v1206_v52  ;;  %v1360_v52 = vrot.slane %v3007_v30, 1  ;;  %v3645_v42 = vpack.c.b16 %v1540_v22, %v1540_v22 }
  0x91   : > { %v1153_v35 = vrot.slane %v1151_v14, 1  ;;  %v1062_v14 = vrot.slane %v1060_v36, 1  ;;  %v1361_v36 = vrot.slane %v3594_v59, 1  ;;  %v1668_v59 = vshll.u32 %v3645_v42, 16 }
  0x93   : > { %v1154_v15 = vor.u32 %v1153_v35, %v1149_v10  ;;  %v1063_v10 = vsel %vm538_vm0, %v1058_v55, %v1062_v14  ;;  %v3010_v35 = vor.u32 %v3009_v5, %v3557_v44  ;;  %v1349_v44 = vrot.slane %v3602_v40, 1 }
  0x94   : > { %v1716_v5 = vshll.u32 %v3640_v11, 16  ;;  %v1362_v55 = vsel %vm811_vm1, %v1360_v52, %v1361_v36  ;;  %v1103_v40 = vshll.u32 %v3544_v33, 16 }
  0x95   : > { %996 = vrot.lane.b32.xlu2 %v2558_v13, %s3135_s6  ;;  %v1159_v8 = vsel %vm538_vm0, %v1154_v15, %v1158_v16  ;;  %v1348_v23 = vrot.slane %v3010_v35, 1  ;;  %v1024_v15 = vunpack.c.l.b16 %v2570_v19  ;;  %v2889_v35 = vld [vmem:[%s3222_s30 + $0xa8] sm:$0xf0] }
  0x96   : > { %994 = vrot.lane.b32.xlu1 %v3398_v7, %s3135_s6  ;;  %v1718_v14 = vrot.slane %v1716_v5, 1 }
  0x97   : > { %v3598_v49 = vpop.permute.xlu2 %753  ;;  %992 = vrot.lane.b32.xlu0 %v3574_v25, %s3135_s6  ;;  %v3661_v20 = vpack.c.b16 %v1024_v15, %v1024_v15  ;;  %v3012_v15 = vld [vmem:[%s3222_s30 + $0x3c] sm:$0xe] }
  0x98   : > { %v3600_v61 = vpop.permute.xlu1 %735  ;;  %v1719_v19 = vsel %vm538_vm0, %v3402_v17, %v1718_v14  ;;  %v2634_v14 = vld [vmem:[%s3222_s30 + $0x50] sm:$0x1] }
  0x99   : > { %v3607_v62 = vpop.permute.xlu0 %731  ;;  %v1108_v52 = vshll.u32 %v3661_v20, 16 }
  0x9d   : > { %1002 = vrot.lane.b32.xlu2 %v3610_v6, %s3135_s6 }
  0x9e   : > { %1000 = vrot.lane.b32.xlu1 %v3588_v47, %s3135_s6 }
  0x9f   : > { %v3623_v13 = vpop.permute.xlu2 %759  ;;  %998 = vrot.lane.b32.xlu0 %v3370_v27, %s3135_s6  ;;  %s3073_s6 = scalar_lea.hbm %s4485_s3, 512 }
  0xa0   : > { %v3627_v41 = vpop.permute.xlu1 %737 }
  0xa1   : > { %v3631_v58 = vpop.permute.xlu0 %743 }
  0xa5   : > { %1268 = vrot.lane.b32.xlu2 %v1207_v34, %s3136_s7  ;;  %v1350_v34 = vsel %vm811_vm1, %v1348_v23, %v1349_v44  ;;  %v2884_v23 = vld [vmem:[%s3222_s30 + $0x78] sm:$0xe] }
  0xa6   : > { %1260 = vrot.lane.b32.xlu1 %v1159_v8, %s3136_s7 }
  0xa7   : > { %v863_v60 = vpop.permute.xlu2 %862  ;;  %1244 = vrot.lane.b32.xlu0 %v1063_v10, %s3136_s7  ;;  %v1670_v10 = vrot.slane %v1668_v59, 1  ;;  %v3015_v59 = vld [vmem:[%s3222_s30 + $0xc] sm:$0xe] }
  0xa8   : > { %v746_v32 = vpop.permute.xlu1 %745 }
  0xa9   : > { %v734_v2 = vpop.permute.xlu0 %733  ;;  %v1671_v44 = vsel %vm538_vm0, %v3383_v43, %v1670_v10  ;;  %v1873_v10 = vrot.slane %v3640_v11, 1  ;;  %v3013_v11 = vor.u32 %v3012_v15, %v3547_v53  ;;  %v2575_v15 = vld [vmem:[%s3222_s30 + $0x80] sm:$0x1] }
  0xaa   : > { %v1920_v16 = vsel %vm1916_vm2, %v3308_v4, %v734_v2  ;;  %v1926_v4 = vsel %vm1916_vm2, %v3225_v0, %v3551_v46  ;;  %v1101_v0 = vshrl.u32 %v3544_v33, 16  ;;  %v1105_v46 = vrot.slane %v1103_v40, 1  ;;  %v2883_v2 = vld [vmem:[%s3222_s30 + $0x78] sm:$0xf0] }
  0xab   : > { %v3657_v37 = vsel %vm1949_vm3, %v1920_v16, %v863_v60  ;;  %v2890_v60 = vld [vmem:[%s3222_s30 + $0xa8] sm:$0xe]  ;;  %v2885_v33 = vor.u32 %v2884_v23, %v2883_v2  ;;  %v1932_v40 = vsel %vm1916_vm2, %v3294_v57, %v746_v32  ;;  %v1861_v57 = vrot.slane %v3645_v42, 1  ;;  %v2815_v23 = vld [vmem:[%s3222_s30 + $0x18] sm:$0xff]  }
  0xac   : > { %v2891_v5 = vor.u32 %v2890_v60, %v2889_v35  ;;  %v1106_v16 = vor.u32 %v1105_v46, %v1101_v0  ;;  %v2630_v60 = vld [vmem:[%s3222_s30 + $0x20] sm:$0x1]  ;;  %v1536_v32 = vunpack.c.l.b16 %v2634_v14  ;;  %v1567_v53 = vshll.u32 %v2815_v23, 16 }
  0xad   : > { %1500 = vrot.lane.b32.xlu2 %v3347_v56, %s3137_s8  ;;  %v1860_v0 = vrot.slane %v2885_v33, 1  ;;  %v2976_v14 = vld [vmem:[%s3222_s30] sm:$0xff]  }
  0xae   : > { %1396 = vrot.lane.b32.xlu1 %v1362_v55, %s3138_s9  ;;  %v1110_v55 = vrot.slane %v1108_v52, 1  ;;  %v3702_v52 = vld [vmem:[%s3222_s30 + $0x48] sm:$0xff]   ;;  %v3710_v42 = vpack.c.b16 %v1536_v32, %v1536_v32 }
  0xaf   : > { %v869_v8 = vpop.permute.xlu2 %868  ;;  %1388 = vrot.lane.b32.xlu0 %v1350_v34, %s3138_s9 }
  0xb0   : > { %v752_v30 = vpop.permute.xlu1 %751  ;;  %v3668_v22 = vsel %vm1949_vm3, %v1926_v4, %v869_v8  ;;  %v1872_v8 = vrot.slane %v2891_v5, 1  ;;  %v1862_v5 = vsel %vm811_vm1, %v1860_v0, %v1861_v57  ;;  %v1620_v57 = vshll.u32 %v3710_v42, 16 }
  0xb1   : > { %v3677_v36 = vpop.permute.xlu0 %749 }
  0xb2   : > { %v1874_v2 = vsel %vm811_vm1, %v1872_v8, %v1873_v10  ;;  %v1918_v8 = vsel %vm1916_vm2, %v2976_v14, %v3607_v62  ;;  %v1325_v10 = vrot.slane %v3613_v26, 1  ;;  %v2871_v14 = vld [vmem:[%s3222_s30 + $0x18] sm:$0xf0] }
  0xb5   : > { %1780 = vrot.lane.b32.xlu2 %v1719_v19, %s3139_s10  ;;  %v1111_v19 = vsel %vm538_vm0, %v1106_v16, %v1110_v55  ;;  %v1615_v16 = vshll.u32 %v3702_v52, 16  ;;  %v1938_v55 = vsel %vm1916_vm2, %v3347_v56, %v752_v30 }
  0xb6   : > { %1772 = vrot.lane.b32.xlu1 %v1671_v44, %s3139_s10  ;;  %v1532_v44 = vunpack.c.l.b16 %v2630_v60  ;;  %v1613_v60 = vshrl.u32 %v3702_v52, 16 }
  0xb7   : > { %v875_v34 = vpop.permute.xlu2 %874  ;;  %1508 = vrot.lane.b32.xlu0 %v3370_v27, %s3137_s8  ;;  %v3016_v27 = vor.u32 %v3015_v59, %v3511_v28  ;;  %v1337_v28 = vrot.slane %v3661_v20, 1  ;;  %v1617_v0 = vrot.slane %v1615_v16, 1  ;;  %v1029_v20 = vunpack.c.l.b16 %v2575_v15 }
  0xb8   : > { %v3691_v4 = vsel %vm1949_vm3, %v1932_v40, %v875_v34  ;;  %v758_v35 = vpop.permute.xlu1 %757  ;;  %v1336_v34 = vrot.slane %v3013_v11, 1  ;;  %v3721_v59 = vpack.c.b16 %v1532_v44, %v1532_v44  ;;  %v1569_v11 = vrot.slane %v1567_v53, 1 }
  0xb9   : > { %v3699_v46 = vpop.permute.xlu0 %755  ;;  %v1324_v30 = vrot.slane %v3016_v27, 1  ;;  %v1618_v27 = vor.u32 %v1617_v0, %v1613_v60  ;;  %v3737_v16 = vpack.c.b16 %v1029_v20, %v1029_v20  ;;  %v2579_v60 = vld [vmem:[%s3222_s30 + $0xb0] sm:$0x1]  ;;  %v2977_v0 = vld [vmem:[%s3222_s30 + $0x18] sm:$0xff]   ;;  %v3764_v20 = vld [vmem:[%s3222_s30 + $0x84] sm:$0xf0] }
  0xba   : > { %v1338_v62 = vsel %vm811_vm1, %v1336_v34, %v1337_v28  ;;  %v1572_v44 = vshll.u32 %v3721_v59, 16  ;;  %v1924_v34 = vsel %vm1916_vm2, %v3248_v24, %v3627_v41  ;;  %v1922_v24 = vsel %vm1916_vm2, %v2977_v0, %v3600_v61  ;;  %v2865_v61 = vld [vmem:[%s3222_s30 + $0xa8] sm:$0xf0]  ;;  %v2860_v0 = vld [vmem:[%s3222_s30 + $0x78] sm:$0xe] }
  0xbb   : > { %v1326_v26 = vsel %vm811_vm1, %v1324_v30, %v1325_v10  ;;  %v1168_v30 = vshll.u32 %v3737_v16, 16  ;;  %v2872_v10 = vld [vmem:[%s3222_s30 + $0x18] sm:$0xe] }
  0xbd   : > { %1252 = vrot.lane.b32.xlu2 %v1111_v19, %s3136_s7 }
  0xbe   : > { %1908 = vrot.lane.b32.xlu1 %v1874_v2, %s3140_s11  ;;  %v1565_v2 = vshrl.u32 %v2815_v23, 16 }
  0xbf   : > { %v881_v33 = vpop.permute.xlu2 %880  ;;  %1900 = vrot.lane.b32.xlu0 %v1862_v5, %s3140_s11  ;;  %v1622_v5 = vrot.slane %v1620_v57, 1  ;;  %v3761_v57 = vld [vmem:[%s3222_s30 + $0x84] sm:$0xff]  }
  0xc0   : > { %v3718_v40 = vsel %vm1949_vm3, %v1938_v55, %v881_v33  ;;  %v861_v56 = vpop.permute.xlu1 %860  ;;  %v1944_v55 = vsel %vm1916_vm2, %v3378_v39, %v758_v35  ;;  %v1570_v53 = vor.u32 %v1569_v11, %v1565_v2  ;;  %v2877_v39 = vld [vmem:[%s3222_s30 + $0x48] sm:$0xf0]  ;;  %v2878_v35 = vld [vmem:[%s3222_s30 + $0x48] sm:$0xe] }
  0xc1   : > { %v1951_v19 = vsel %vm1949_vm3, %v1918_v8, %v861_v56  ;;  %v3731_v32 = vpop.permute.xlu0 %761  ;;  %v1623_v56 = vsel %vm538_vm0, %v1618_v27, %v1622_v5  ;;  %v1170_v27 = vrot.slane %v1168_v30, 1  ;;  %v2866_v5 = vld [vmem:[%s3222_s30 + $0xa8] sm:$0xe] }
  0xc5   : > { %1484 = vrot.lane.b32.xlu2 %v2815_v23, %s3137_s8  ;;  %v1574_v23 = vrot.slane %v1572_v44, 1  ;;  %v2873_v44 = vor.u32 %v2872_v10, %v2871_v14  ;;  %v2867_v10 = vor.u32 %v2866_v5, %v2865_v61  ;;  %v3803_v5 = vld [vmem:[%s3222_s30 + $0xb4] sm:$0xff]  }
  0xc6   : > { %1380 = vrot.lane.b32.xlu1 %v1338_v62, %s3138_s9  ;;  %v2879_v62 = vor.u32 %v2878_v35, %v2877_v39  ;;  %v1849_v39 = vrot.slane %v3710_v42, 1 }
  0xc7   : > { %v887_v33 = vpop.permute.xlu2 %886  ;;  %1372 = vrot.lane.b32.xlu0 %v1326_v26, %s3138_s9  ;;  %v1575_v11 = vsel %vm538_vm0, %v1570_v53, %v1574_v23  ;;  %v1033_v26 = vunpack.c.l.b16 %v2579_v60  ;;  %v1836_v14 = vrot.slane %v2873_v44, 1  ;;  %v2859_v60 = vld [vmem:[%s3222_s30 + $0x78] sm:$0xf0] }
  0xc8   : > { %v3743_v15 = vsel %vm1949_vm3, %v1944_v55, %v887_v33  ;;  %v867_v28 = vpop.permute.xlu1 %866  ;;  %v2639_v33 = vld [vmem:[%s3222_s30 + $0x8c] sm:$0x1]  ;;  %v1848_v23 = vrot.slane %v2879_v62, 1  ;;  %v1363_v62 = vrot.slane %v2867_v10, 1 }
  0xc9   : > { %v1957_v8 = vsel %vm1949_vm3, %v1924_v34, %v867_v28  ;;  %v865_v41 = vpop.permute.xlu0 %864  ;;  %v2978_v34 = vld [vmem:[%s3222_s30 + $0x48] sm:$0xff]   ;;  %v1049_v30 = vpack.c.b16 %v1033_v26, %v1033_v26 }
  0xca   : > { %v3767_v2 = vsel %vm1949_vm3, %v1922_v24, %v865_v41  ;;  %v1930_v28 = vsel %vm1916_vm2, %v2978_v34, %v3631_v58  ;;  %v1541_v24 = vunpack.c.l.b16 %v2639_v33 }
  0xcb   : > { %v1364_v44 = vrot.slane %v1049_v30, 1  ;;  %v1216_v26 = vshll.u32 %v1049_v30, 16 }
  0xcd   : > { %1764 = vrot.lane.b32.xlu2 %v1623_v56, %s3139_s10  ;;  %v1837_v56 = vrot.slane %v3721_v59, 1  ;;  %v1850_v59 = vsel %vm811_vm1, %v1848_v23, %v1849_v39  ;;  %v1365_v39 = vsel %vm811_vm1, %v1363_v62, %v1364_v44  ;;  %v1942_v44 = vsel %vm1916_vm2, %v3398_v7, %v3699_v46  ;;  %v2567_v46 = vld [vmem:[%s3222_s30 + $0x20] sm:$0x1] }
  0xce   : > { %1756 = vrot.lane.b32.xlu1 %v1575_v11, %s3139_s10  ;;  %v2861_v11 = vor.u32 %v2860_v0, %v2859_v60  ;;  %v3018_v60 = vld [vmem:[%s3222_s30 + $0xb4] sm:$0xe] }
  0xcf   : > { %v973_v55 = vpop.permute.xlu2 %972  ;;  %1492 = vrot.lane.b32.xlu0 %v3702_v52, %s3137_s8  ;;  %v1928_v52 = vsel %vm1916_vm2, %v3281_v50, %v3580_v1  ;;  %v1838_v61 = vsel %vm811_vm1, %v1836_v14, %v1837_v56  ;;  %v3017_v50 = vld [vmem:[%s3222_s30 + $0xb4] sm:$0xf0]  ;;  %v1673_v56 = vshrl.u32 %v3761_v57, 16 }
  0xd0   : > { %v3779_v53 = vsel %vm1982_vm4, %v1951_v19, %v973_v55  ;;  %v873_v35 = vpop.permute.xlu1 %872  ;;  %v1171_v19 = vsel %vm538_vm0, %v3383_v43, %v1170_v27  ;;  %v3799_v43 = vpack.c.b16 %v1541_v24, %v1541_v24  ;;  %v1675_v27 = vshll.u32 %v3761_v57, 16 }
  0xd1   : > { %v1963_v58 = vsel %vm1949_vm3, %v1930_v28, %v873_v35  ;;  %v871_v42 = vpop.permute.xlu0 %870  ;;  %v1936_v55 = vsel %vm1916_vm2, %v3353_v63, %v3677_v36  ;;  %v1351_v34 = vrot.slane %v2861_v11, 1  ;;  %v1352_v28 = vrot.slane %v3737_v16, 1  ;;  %v2643_v36 = vld [vmem:[%s3222_s30 + $0xbc] sm:$0x1] }
  0xd2   : > { %v3794_v41 = vsel %vm1949_vm3, %v1928_v52, %v871_v42  ;;  %v1218_v35 = vrot.slane %v1216_v26, 1  ;;  %v1677_v30 = vrot.slane %v1675_v27, 1  ;;  %v1680_v63 = vshll.u32 %v3799_v43, 16  ;;  %v3021_v52 = vld [vmem:[%s3222_s30 + $0x84] sm:$0xe] }
  0xd3   : > { %v1545_v24 = vunpack.c.l.b16 %v2643_v36  ;;  %v1021_v36 = vunpack.c.l.b16 %v2567_v46 }
  0xd4   : > { %v1219_v42 = vsel %vm538_vm0, %v3402_v17, %v1218_v35  ;;  %v1682_v11 = vrot.slane %v1680_v63, 1  ;;  %v2571_v17 = vld [vmem:[%s3222_s30 + $0x50] sm:$0x1]  ;;  %v1721_v35 = vshrl.u32 %v3803_v5, 16 }
  0xd5   : > { %1262 = vrot.lane.b32.xlu2 %v1171_v19, %s3136_s7  ;;  %v1353_v19 = vsel %vm811_vm1, %v1351_v34, %v1352_v28  ;;  %v1561_v27 = vpack.c.b16 %v1545_v24, %v1545_v24  ;;  %v3019_v34 = vor.u32 %v3018_v60, %v3017_v50 }
  0xd6   : > { %1892 = vrot.lane.b32.xlu1 %v1850_v59, %s3140_s11  ;;  %v1678_v59 = vor.u32 %v1677_v30, %v1673_v56 }
  0xd7   : > { %v979_v1 = vpop.permute.xlu2 %978  ;;  %1884 = vrot.lane.b32.xlu0 %v1838_v61, %s3140_s11  ;;  %v1723_v61 = vshll.u32 %v3803_v5, 16  ;;  %v1728_v50 = vshll.u32 %v1561_v27, 16  ;;  %v1875_v30 = vrot.slane %v3019_v34, 1  ;;  %v1876_v63 = vrot.slane %v1561_v27, 1  ;;  %v3890_v34 = vld [vmem:[%s3222_s30 + $0x24] sm:$0xff]  }
  0xd8   : > { %v3811_v33 = vsel %vm1982_vm4, %v1957_v8, %v979_v1  ;;  %v879_v23 = vpop.permute.xlu1 %878  ;;  %v2979_v8 = vld [vmem:[%s3222_s30 + $0x60] sm:$0xff]  }
  0xd9   : > { %v1969_v14 = vsel %vm1949_vm3, %v1936_v55, %v879_v23  ;;  %v1934_v10 = vsel %vm1916_vm2, %v2979_v8, %v3563_v12  ;;  %v877_v16 = vpop.permute.xlu0 %876  ;;  %v1683_v55 = vsel %vm538_vm0, %v1678_v59, %v1682_v11  ;;  %v3022_v23 = vor.u32 %v3021_v52, %v3764_v20  ;;  %v2848_v8 = vld [vmem:[%s3222_s30 + $0x18] sm:$0xe]  ;;  %v2980_v11 = vld [vmem:[%s3222_s30 + $0xa8] sm:$0xff]  }
  0xda   : > { %v3825_v0 = vsel %vm1949_vm3, %v1934_v10, %v877_v16  ;;  %v1725_v56 = vrot.slane %v1723_v61, 1  ;;  %v1864_v16 = vrot.slane %v3799_v43, 1  ;;  %v1730_v52 = vrot.slane %v1728_v50, 1  ;;  %v3885_v61 = vld [vmem:[%s3222_s30 + $0x54] sm:$0xf0] }
  0xdb   : > { %v1863_v20 = vrot.slane %v3022_v23, 1  ;;  %v1037_v43 = vpack.c.b16 %v1021_v36, %v1021_v36  ;;  %v2635_v23 = vld [vmem:[%s3222_s30 + $0x5c] sm:$0x1] }
  0xdc   : > { %v1726_v24 = vor.u32 %v1725_v56, %v1721_v35 }
  0xdd   : > { %1398 = vrot.lane.b32.xlu2 %v1365_v39, %s3138_s9  ;;  %v1025_v39 = vunpack.c.l.b16 %v2571_v17  ;;  %v1328_v17 = vrot.slane %v1037_v43, 1 }
  0xde   : > { %1390 = vrot.lane.b32.xlu1 %v1353_v19, %s3138_s9  ;;  %v1948_v19 = vsel %vm1916_vm2, %v3417_v48, %v3731_v32  ;;  %v1731_v27 = vsel %vm538_vm0, %v1726_v24, %v1730_v52 }
  0xdf   : > { %v985_v12 = vpop.permute.xlu2 %984  ;;  %1270 = vrot.lane.b32.xlu0 %v1219_v42, %s3136_s7  ;;  %v3864_v60 = vpack.c.b16 %v1025_v39, %v1025_v39  ;;  %v1877_v42 = vsel %vm811_vm1, %v1875_v30, %v1876_v63  ;;  %v2631_v30 = vld [vmem:[%s3222_s30 + $0x2c] sm:$0x1]  ;;  %v3024_v63 = vld [vmem:[%s3222_s30 + $0x24] sm:$0xe] }
  0xe0   : > { %v3834_v62 = vsel %vm1982_vm4, %v1963_v58, %v985_v12  ;;  %v885_v26 = vpop.permute.xlu1 %884  ;;  %v1940_v58 = vsel %vm1916_vm2, %v3323_v21, %v3598_v49  ;;  %v2847_v49 = vld [vmem:[%s3222_s30 + $0x18] sm:$0xf0]  ;;  %v1946_v12 = vsel %vm1916_vm2, %v2980_v11, %v3623_v13 }
  0xe1   : > { %v3843_v1 = vsel %vm1949_vm3, %v1942_v44, %v885_v26  ;;  %v883_v7 = vpop.permute.xlu0 %882  ;;  %v2849_v59 = vor.u32 %v2848_v8, %v2847_v49  ;;  %v1120_v44 = vshll.u32 %v3864_v60, 16  ;;  %v3882_v26 = vld [vmem:[%s3222_s30 + $0x54] sm:$0xff]   ;;  %v2854_v49 = vld [vmem:[%s3222_s30 + $0x48] sm:$0xe]  ;;  %v1537_v8 = vunpack.c.l.b16 %v2635_v23 }
  0xe2   : > { %v3851_v28 = vsel %vm1949_vm3, %v1940_v58, %v883_v7  ;;  %v3023_v58 = vld [vmem:[%s3222_s30 + $0x24] sm:$0xf0]  ;;  %v1627_v52 = vshll.u32 %v3882_v26, 16  ;;  %v1577_v23 = vshrl.u32 %v3890_v34, 16 }
  0xe3   : > { %v1327_v13 = vrot.slane %v2849_v59, 1  ;;  %v1122_v46 = vrot.slane %v1120_v44, 1  ;;  %v1579_v59 = vshll.u32 %v3890_v34, 16  ;;  %v1340_v44 = vrot.slane %v3864_v60, 1  ;;  %v2188_v60 = vld [vmem:[%s4483_s1 + $0x20] sm:$0xf] }
  0xe5   : > { %1774 = vrot.lane.b32.xlu2 %v1683_v55, %s3139_s10  ;;  %v1072_v55 = vshll.u32 %v1037_v43, 16  ;;  %v1329_v56 = vsel %vm811_vm1, %v1327_v13, %v1328_v17  ;;  %v1629_v17 = vrot.slane %v1627_v52, 1 }
  0xe6   : > { %1510 = vrot.lane.b32.xlu1 %v3803_v5, %s3137_s8 }
  0xe7   : > { %v991_v21 = vpop.permute.xlu2 %990  ;;  %1502 = vrot.lane.b32.xlu0 %v3761_v57, %s3137_s8  ;;  %v1865_v57 = vsel %vm811_vm1, %v1863_v20, %v1864_v16  ;;  %v1074_v50 = vrot.slane %v1072_v55, 1  ;;  %v1123_v16 = vsel %vm538_vm0, %v3313_v9, %v1122_v46 }
  0xe8   : > { %v3861_v10 = vsel %vm1982_vm4, %v1969_v14, %v991_v21  ;;  %v891_v5 = vpop.permute.xlu1 %890  ;;  %v2853_v21 = vld [vmem:[%s3222_s30 + $0x48] sm:$0xf0] }
  0xe9   : > { %v1981_v14 = vsel %vm1949_vm3, %v1948_v19, %v891_v5  ;;  %v889_v48 = vpop.permute.xlu0 %888  ;;  %v1075_v19 = vsel %vm538_vm0, %v3260_v31, %v1074_v50  ;;  %v2855_v5 = vor.u32 %v2854_v49, %v2853_v21  ;;  %v2576_v31 = vld [vmem:[%s3222_s30 + $0x8c] sm:$0x1] }
  0xea   : > { %v3877_v32 = vsel %vm1949_vm3, %v1946_v12, %v889_v48  ;;  %v3025_v12 = vor.u32 %v3024_v63, %v3023_v58  ;;  %v1223_v63 = vshll.u32 %v3588_v47, 16 }
  0xed   : > { %1910 = vrot.lane.b32.xlu2 %v1877_v42, %s3140_s11  ;;  %v3918_v42 = vpack.c.b16 %v1537_v8, %v1537_v8 }
  0xee   : > { %1902 = vrot.lane.b32.xlu1 %v1865_v57, %s3140_s11  ;;  %v1339_v57 = vrot.slane %v2855_v5, 1 }
  0xef   : > { %v3894_v7 = vpop.permute.xlu2 %996  ;;  %1782 = vrot.lane.b32.xlu0 %v1731_v27, %s3139_s10  ;;  %v1632_v55 = vshll.u32 %v3918_v42, 16 }
  0xf0   : > { %v977_v39 = vpop.permute.xlu1 %976 }
  0xf1   : > { %v3900_v35 = vsel %vm1982_vm4, %v3767_v2, %v977_v39  ;;  %v975_v36 = vpop.permute.xlu0 %974  ;;  %v1533_v2 = vunpack.c.l.b16 %v2631_v30  ;;  %v1839_v39 = vrot.slane %v3025_v12, 1  ;;  %v2209_v30 = vunpack.c.l.b16 %v2188_v60 }
  0xf2   : > { %v3909_v20 = vsel %vm1982_vm4, %v3657_v37, %v975_v36  ;;  %v2580_v37 = vld [vmem:[%s3222_s30 + $0xbc] sm:$0x1]  ;;  %v1634_v8 = vrot.slane %v1632_v55, 1 }
  0xf3   : > { %v1549_v11 = vpack.c.b16 %v1533_v2, %v1533_v2  ;;  %v1034_v27 = vunpack.c.l.b16 %v2580_v37  ;;  %v2214_v2 = vpack.c.b16 %v2209_v30, %v2209_v30  ;;  %v2640_v30 = vld [vmem:[%s3222_s30 + $0x98] sm:$0x1] }
  0xf5   : > { %1374 = vrot.lane.b32.xlu2 %v1329_v56, %s3138_s9  ;;  %v1840_v58 = vrot.slane %v1549_v11, 1  ;;  %v1581_v56 = vrot.slane %v1579_v59, 1  ;;  %v1584_v50 = vshll.u32 %v1549_v11, 16  ;;  %v3946_v36 = vpack.c.b16 %v1034_v27, %v1034_v27 }
  0xf6   : > { %1254 = vrot.lane.b32.xlu1 %v1123_v16, %s3136_s7  ;;  %v3027_v16 = vld [vmem:[%s3222_s30 + $0x54] sm:$0xe]  ;;  %v1225_v59 = vrot.slane %v1223_v63, 1 }
  0xf7   : > { %v1003_v24 = vpop.permute.xlu2 %1002  ;;  %1246 = vrot.lane.b32.xlu0 %v1075_v19, %s3136_s7  ;;  %v1582_v52 = vor.u32 %v1581_v56, %v1577_v23  ;;  %v1586_v37 = vrot.slane %v1584_v50, 1  ;;  %v1228_v11 = vshll.u32 %v3946_v36, 16  ;;  %v3033_v23 = vld [vmem:[%s3222_s30 + $0x84] sm:$0xe]  ;;  %v2701_v56 = vld [vmem:[%s4483_s1 + $0x10] sm:$0xff] }
  0xf8   : > { %v3922_v43 = vsel %vm1982_vm4, %v1981_v14, %v1003_v24  ;;  %v983_v9 = vpop.permute.xlu1 %982  ;;  %v1625_v14 = vshrl.u32 %v3882_v26, 16  ;;  %v1841_v24 = vsel %vm811_vm1, %v1839_v39, %v1840_v58 }
  0xf9   : > { %v3929_v48 = vsel %vm1982_vm4, %v3794_v41, %v983_v9  ;;  %v981_v13 = vpop.permute.xlu0 %980  ;;  %v1030_v41 = vunpack.c.l.b16 %v2576_v31  ;;  %v1221_v9 = vshrl.u32 %v3588_v47, 16  ;;  %v1230_v58 = vrot.slane %v1228_v11, 1 }
  0xfa   : > { %v3936_v46 = vsel %vm1982_vm4, %v3668_v22, %v981_v13  ;;  %v1341_v22 = vsel %vm811_vm1, %v1339_v57, %v1340_v44  ;;  %v1630_v49 = vor.u32 %v1629_v17, %v1625_v14  ;;  %v1173_v44 = vshrl.u32 %v3574_v25, 16  ;;  %v2702_v13 = vld [vmem:[%s4483_s1 + $0x18] sm:$0xff]  ;;  %v3030_v14 = vld [vmem:[%s3222_s30 + $0xb4] sm:$0xe] }
  0xfb   : > { %v3954_v19 = vpack.c.b16 %v1030_v41, %v1030_v41  ;;  %v1587_v17 = vsel %vm538_vm0, %v1582_v52, %v1586_v37  ;;  %v1226_v55 = vor.u32 %v1225_v59, %v1221_v9  ;;  %v2644_v41 = vld [vmem:[%s3222_s30 + $0xc8] sm:$0x1]  ;;  %v1235_v52 = vshll.u32 %v3610_v6, 16  ;;  %v2820_v37 = vld [vmem:[%s3222_s30 + $0x90] sm:$0xff]   ;;  %v2568_v59 = vld [vmem:[%s3222_s30 + $0x2c] sm:$0x1] }
  0xfc   : > { %v1635_v31 = vsel %vm538_vm0, %v1630_v49, %v1634_v8  ;;  %v1546_v8 = vunpack.c.l.b16 %v2644_v41  ;;  %v1687_v11 = vshll.u32 %v2820_v37, 16 }
  0xfd   : > { %1494 = vrot.lane.b32.xlu2 %v3882_v26, %s3137_s8  ;;  %v1175_v26 = vshll.u32 %v3574_v25, 16  ;;  %v1180_v47 = vshll.u32 %v3954_v19, 16 }
  0xfe   : > { %1486 = vrot.lane.b32.xlu1 %v3890_v34, %s3137_s8  ;;  %v2254_v34 = vsel %vm2252_vm5, %v2214_v2, 0  ;;  %v4006_v9 = vpack.c.b16 %v1546_v8, %v1546_v8 }
  0xff   : > { %v3950_v21 = vpop.permute.xlu2 %1268  ;;  %1382 = vrot.lane.b32.xlu0 %v1341_v22, %s3138_s9  ;;  %2896 = vmatpush.bf16.msra.mxu2 %v2254_v34  ;;  %v1177_v27 = vrot.slane %v1175_v26, 1  ;;  %v1182_v39 = vrot.slane %v1180_v47, 1  ;;  %v1231_v22 = vsel %vm538_vm0, %v1226_v55, %v1230_v58  ;;  %v3031_v26 = vor.u32 %v3030_v14, %v3591_v54 }
 0x100   : > { %v3957_v5 = vpop.permute.xlu1 %988  ;;  %2897 = vmatpush.bf16.msra.mxu3 %v2254_v34  ;;  %2259 = vmatpush.bf16.msra.mxu0 %v2254_v34  ;;  %v1237_v47 = vrot.slane %v1235_v52, 1  ;;  %v1740_v55 = vshll.u32 %v4006_v9, 16  ;;  %v1022_v58 = vunpack.c.l.b16 %v2568_v59  ;;  %v2572_v59 = vld [vmem:[%s3222_s30 + $0x5c] sm:$0x1] }
 0x101   : > { %v987_v12 = vpop.permute.xlu0 %986  ;;  %2895 = vmatpush.bf16.msra.mxu1 %v2254_v34  ;;  %v1178_v60 = vor.u32 %v1177_v27, %v1173_v44  ;;  %v3034_v34 = vor.u32 %v3033_v23, %v3577_v45  ;;  %v2699_v45 = vld [vmem:[%s4483_s1] sm:$0xff]  ;;  %v1233_v27 = vshrl.u32 %v3610_v6, 16  ;;  %v1685_v23 = vshrl.u32 %v2820_v37, 16 }
 0x102   : > { %v3965_v57 = vsel %vm1982_vm4, %v3691_v4, %v987_v12  ;;  %v3028_v4 = vor.u32 %v3027_v16, %v3885_v61  ;;  %v1852_v61 = vrot.slane %v3918_v42, 1  ;;  %v1366_v12 = vrot.slane %v3031_v26, 1  ;;  %v2886_v26 = vld [vmem:[%s3222_s30 + $0x90] sm:$0xf0] }
 0x103   : > { %2899 = vmatpush.bf16.msra.mxu2 %v2702_v13  ;;  %v1183_v42 = vsel %vm538_vm0, %v1178_v60, %v1182_v39  ;;  %v1354_v14 = vrot.slane %v3034_v34, 1  ;;  %v1689_v60 = vrot.slane %v1687_v11, 1  ;;  %v2887_v34 = vld [vmem:[%s3222_s30 + $0x90] sm:$0xe]  ;;  %v3036_v11 = vld [vmem:[%s3222_s30 + $0x54] sm:$0xe] }
 0x104   : > { %2900 = vmatpush.bf16.msra.mxu3 %v2702_v13  ;;  %2260 = vmatpush.bf16.msra.mxu0 %v2702_v13  ;;  %v1851_v49 = vrot.slane %v3028_v4, 1 }
 0x105   : > { %1886 = vrot.lane.b32.xlu2 %v1841_v24, %s3140_s11  ;;  %2898 = vmatpush.bf16.msra.mxu1 %v2702_v13  ;;  %v2700_v24 = vld [vmem:[%s4483_s1 + $0x8] sm:$0xff] }
 0x106   : > { %1766 = vrot.lane.b32.xlu1 %v1635_v31, %s3139_s10  ;;  %v1367_v31 = vrot.slane %v3946_v36, 1  ;;  %v1355_v36 = vrot.slane %v3954_v19, 1  ;;  %v1079_v19 = vshll.u32 %v3525_v29, 16 }
 0x107   : > { %v3978_v25 = vpop.permute.xlu2 %1500  ;;  %1758 = vrot.lane.b32.xlu0 %v1587_v17, %s3139_s10  ;;  %2902 = vmatpush.bf16.msra.mxu2 %v2701_v56 }
 0x108   : > { %v995_v50 = vpop.permute.xlu1 %994  ;;  %2903 = vmatpush.bf16.msra.mxu3 %v2701_v56  ;;  %2261 = vmatpush.bf16.msra.mxu0 %v2701_v56  ;;  %v1368_v39 = vsel %vm811_vm1, %v1366_v12, %v1367_v31  ;;  %v1081_v52 = vrot.slane %v1079_v19, 1 }
 0x109   : > { %v3989_v63 = vsel %vm1982_vm4, %v3851_v28, %v995_v50  ;;  %v993_v16 = vpop.permute.xlu0 %992  ;;  %v1542_v28 = vunpack.c.l.b16 %v2640_v30  ;;  %2901 = vmatpush.bf16.msra.mxu1 %v2701_v56  ;;  %v4034_v56 = vor.u32 %v1237_v47, %v1233_v27  ;;  %v1356_v50 = vsel %vm811_vm1, %v1354_v14, %v1355_v36  ;;  %v3039_v27 = vld [vmem:[%s3222_s30 + $0x24] sm:$0xe] }
 0x10a   : > { %v3994_v2 = vsel %vm1982_vm4, %v3718_v40, %v993_v16  ;;  %v1853_v40 = vsel %vm811_vm1, %v1851_v49, %v1852_v61  ;;  %v4037_v61 = vpack.c.b16 %v1022_v58, %v1022_v58  ;;  %v2892_v16 = vld [vmem:[%s3222_s30 + $0xc0] sm:$0xf0]  ;;  %v1026_v14 = vunpack.c.l.b16 %v2572_v59 }
 0x10b   : > { %2905 = vmatpush.bf16.msra.mxu2 %v2700_v24  ;;  %v4013_v44 = vpack.c.b16 %v1542_v28, %v1542_v28  ;;  %v1879_v58 = vrot.slane %v4006_v9, 1 }
 0x10c   : > { %2906 = vmatpush.bf16.msra.mxu3 %v2700_v24  ;;  %2262 = vmatpush.bf16.msra.mxu0 %v2700_v24 }
 0x10d   : > { %1272 = vrot.lane.b32.xlu2 %v1231_v22, %s3136_s7  ;;  %2904 = vmatpush.bf16.msra.mxu1 %v2700_v24  ;;  %v1690_v22 = vor.u32 %v1689_v60, %v1685_v23  ;;  %v1077_v24 = vshrl.u32 %v3525_v29, 16  ;;  %v2632_v29 = vld [vmem:[%s3222_s30 + $0x38] sm:$0x1]  ;;  %v1867_v60 = vrot.slane %v4013_v44, 1 }
 0x10e   : > { %1264 = vrot.lane.b32.xlu1 %v1183_v42, %s3136_s7  ;;  %v2893_v42 = vld [vmem:[%s3222_s30 + $0xc0] sm:$0xe] }
 0x10f   : > { %v4009_v54 = vpop.permute.xlu2 %1780  ;;  %1894 = vrot.lane.b32.xlu0 %v1853_v40, %s3140_s11  ;;  %2908 = vmatpush.bf16.msra.mxu2 %v2699_v45  ;;  %v2894_v31 = vor.u32 %v2893_v42, %v2892_v16  ;;  %v1082_v47 = vor.u32 %v1081_v52, %v1077_v24  ;;  %v3040_v16 = vor.u32 %v3039_v27, %v3528_v51  ;;  %v1125_v24 = vshrl.u32 %v3536_v3, 16 }
 0x110   : > { %v1001_v13 = vpop.permute.xlu1 %1000  ;;  %2909 = vmatpush.bf16.msra.mxu3 %v2699_v45  ;;  %2263 = vmatpush.bf16.msra.mxu0 %v2699_v45 }
 0x111   : > { %v4022_v17 = vsel %vm1982_vm4, %v3877_v32, %v1001_v13  ;;  %v999_v4 = vpop.permute.xlu0 %998  ;;  %v1692_v32 = vshll.u32 %v4013_v44, 16  ;;  %2907 = vmatpush.bf16.msra.mxu1 %v2699_v45  ;;  %v2888_v45 = vor.u32 %v2887_v34, %v2886_v26  ;;  %v1330_v51 = vrot.slane %v3040_v16, 1  ;;  %v2874_v16 = vld [vmem:[%s3222_s30 + $0x30] sm:$0xf0] }
 0x112   : > { %v4028_v41 = vsel %vm1982_vm4, %v3743_v15, %v999_v4  ;;  %v1742_v15 = vrot.slane %v1740_v55, 1  ;;  %v1878_v55 = vrot.slane %v2894_v31, 1  ;;  %v1331_v34 = vrot.slane %v4037_v61, 1 }
 0x113   : > { %v1694_v49 = vrot.slane %v1692_v32, 1  ;;  %v1866_v23 = vrot.slane %v2888_v45, 1  ;;  %v1127_v32 = vshll.u32 %v3536_v3, 16 }
 0x114   : > { %v1743_v28 = vsel %vm538_vm0, %v4034_v56, %v1742_v15  ;;  %v3037_v15 = vor.u32 %v3036_v11, %v3539_v38  ;;  %v1880_v9 = vsel %vm811_vm1, %v1878_v55, %v1879_v58  ;;  %v1332_v55 = vsel %vm811_vm1, %v1330_v51, %v1331_v34 }
 0x115   : > { %1504 = vrot.lane.b32.xlu2 %v2820_v37, %s3137_s8  ;;  %v1084_v37 = vshll.u32 %v4037_v61, 16  ;;  %v1695_v12 = vsel %vm538_vm0, %v1690_v22, %v1694_v49  ;;  %v4072_v22 = vld [vmem:[%s3222_s30 + $0x30] sm:$0xff]   ;;  %v1129_v38 = vrot.slane %v1127_v32, 1  ;;  %v2880_v32 = vld [vmem:[%s3222_s30 + $0x60] sm:$0xf0] }
 0x116   : > { %1400 = vrot.lane.b32.xlu1 %v1368_v39, %s3138_s9  ;;  %v1534_v39 = vunpack.c.l.b16 %v2632_v29  ;;  %v1591_v26 = vshll.u32 %v4072_v22, 16  ;;  %v1589_v11 = vshrl.u32 %v4072_v22, 16  ;;  %v2000_v29 = vsel %vm1982_vm4, %v3825_v0, %v3957_v5 }
 0x117   : > { %v4040_v30 = vpop.permute.xlu2 %1252  ;;  %1392 = vrot.lane.b32.xlu0 %v1356_v50, %s3138_s9  ;;  %v1086_v13 = vrot.slane %v1084_v37, 1  ;;  %v1042_v50 = vpack.c.b16 %v1026_v14, %v1026_v14  ;;  %v1130_v45 = vor.u32 %v1129_v38, %v1125_v24 }
 0x118   : > { %v4043_v8 = vpop.permute.xlu1 %1260  ;;  %v4078_v42 = vpack.c.b16 %v1534_v39, %v1534_v39 }
 0x119   : > { %v4053_v40 = vpop.permute.xlu0 %1244  ;;  %v1087_v19 = vsel %vm538_vm0, %v1082_v47, %v1086_v13  ;;  %v1343_v44 = vrot.slane %v1042_v50, 1  ;;  %v1132_v52 = vshll.u32 %v1042_v50, 16  ;;  %v2008_v47 = vsel %vm1982_vm4, %v3843_v1, %v3894_v7  ;;  %v2636_v13 = vld [vmem:[%s3222_s30 + $0x68] sm:$0x1] }
 0x11a   : > { %v1596_v31 = vshll.u32 %v4078_v42, 16  ;;  %v2041_v14 = vsel %vm2015_vm6, %v2008_v47, %v3950_v21  ;;  %v2033_v21 = vsel %vm2015_vm6, %v2000_v29, %v4043_v8  ;;  %v1538_v5 = vunpack.c.l.b16 %v2636_v13  ;;  %v2862_v47 = vld [vmem:[%s3222_s30 + $0x90] sm:$0xf0] }
 0x11b   : > { %v1134_v27 = vrot.slane %v1132_v52, 1 }
 0x11c   : > { %v1598_v7 = vrot.slane %v1596_v31, 1 }
 0x11d   : > { %1784 = vrot.lane.b32.xlu2 %v1743_v28, %s3139_s10  ;;  %v1342_v28 = vrot.slane %v3037_v15, 1  ;;  %v1135_v0 = vsel %vm538_vm0, %v1130_v45, %v1134_v27 }
 0x11e   : > { %1776 = vrot.lane.b32.xlu1 %v1695_v12, %s3139_s10  ;;  %v1593_v12 = vrot.slane %v1591_v26, 1 }
 0x11f   : > { %v4062_v36 = vpop.permute.xlu2 %1484  ;;  %1512 = vrot.lane.b32.xlu0 %v3610_v6, %s3137_s8  ;;  %v1868_v6 = vsel %vm811_vm1, %v1866_v23, %v1867_v60  ;;  %v1344_v3 = vsel %vm811_vm1, %v1342_v28, %v1343_v44  ;;  %v2818_v23 = vld [vmem:[%s3222_s30 + $0x60] sm:$0xff]   ;;  %v1554_v28 = vpack.c.b16 %v1538_v5, %v1538_v5  ;;  %v4144_v5 = vld [vmem:[%s3222_s30 + $0xcc] sm:$0xff]  }
 0x120   : > { %v1397_v4 = vpop.permute.xlu1 %1396  ;;  %v1594_v1 = vor.u32 %v1593_v12, %v1589_v11  ;;  %v1639_v8 = vshll.u32 %v2818_v23, 16 }
 0x121   : > { %v1389_v49 = vpop.permute.xlu0 %1388  ;;  %v2074_v58 = vsel %vm2048_vm7, %v2041_v14, %v1397_v4  ;;  %v1644_v45 = vshll.u32 %v1554_v28, 16  ;;  %v1843_v14 = vrot.slane %v4078_v42, 1 }
 0x122   : > { %v2066_v39 = vsel %vm2048_vm7, %v2033_v21, %v1389_v49  ;;  %v2875_v49 = vld [vmem:[%s3222_s30 + $0x30] sm:$0xe]  ;;  %v1641_v12 = vrot.slane %v1639_v8, 1 }
 0x123   : > { %v2099_v44 = vsel %vm2081_vm8, %v2066_v39, %v3978_v25  ;;  %v2876_v34 = vor.u32 %v2875_v49, %v2874_v16  ;;  %v1637_v25 = vshrl.u32 %v2818_v23, 16 }
 0x125   : > { %1248 = vrot.lane.b32.xlu2 %v1087_v19, %s3136_s7  ;;  %v2881_v19 = vld [vmem:[%s3222_s30 + $0x60] sm:$0xe]  ;;  %v1842_v13 = vrot.slane %v2876_v34, 1 }
 0x126   : > { %1912 = vrot.lane.b32.xlu1 %v1880_v9, %s3140_s11  ;;  %v1599_v9 = vsel %vm538_vm0, %v1594_v1, %v1598_v7  ;;  %v2882_v24 = vor.u32 %v2881_v19, %v2880_v32  ;;  %v1646_v7 = vrot.slane %v1644_v45, 1 }
 0x127   : > { %v4083_v37 = vpop.permute.xlu2 %1764  ;;  %1904 = vrot.lane.b32.xlu0 %v1868_v6, %s3140_s11  ;;  %v2581_v6 = vld [vmem:[%s3222_s30 + $0xc8] sm:$0x1] }
 0x128   : > { %v1773_v59 = vpop.permute.xlu1 %1772  ;;  %v1035_v11 = vunpack.c.l.b16 %v2581_v6  ;;  %v1854_v31 = vrot.slane %v2882_v24, 1  ;;  %v2868_v6 = vld [vmem:[%s3222_s30 + $0xc0] sm:$0xf0] }
 0x129   : > { %v1509_v61 = vpop.permute.xlu0 %1508  ;;  %v2132_v38 = vsel %vm2114_vm9, %v2099_v44, %v1773_v59  ;;  %v2869_v44 = vld [vmem:[%s3222_s30 + $0xc0] sm:$0xe] }
 0x12a   : > { %v2107_v60 = vsel %vm2081_vm8, %v2074_v58, %v1509_v61  ;;  %v2863_v61 = vld [vmem:[%s3222_s30 + $0x90] sm:$0xe]  ;;  %v4135_v29 = vpack.c.b16 %v1035_v11, %v1035_v11  ;;  %v2870_v11 = vor.u32 %v2869_v44, %v2868_v6  ;;  %v3045_v44 = vld [vmem:[%s3222_s30 + $0xcc] sm:$0xe] }
 0x12b   : > { %v2140_v15 = vsel %vm2114_vm9, %v2107_v60, %v4009_v54  ;;  %v2577_v54 = vld [vmem:[%s3222_s30 + $0x98] sm:$0x1]  ;;  %v2864_v21 = vor.u32 %v2863_v61, %v2862_v47  ;;  %v1747_v47 = vshll.u32 %v4144_v5, 16 }
 0x12c   : > { %v1031_v59 = vunpack.c.l.b16 %v2577_v54  ;;  %v1240_v42 = vshll.u32 %v4135_v29, 16  ;;  %v1369_v61 = vrot.slane %v2870_v11, 1 }
 0x12d   : > { %1384 = vrot.lane.b32.xlu2 %v1344_v3, %s3138_s9  ;;  %v1855_v3 = vrot.slane %v1554_v28, 1  ;;  %v1357_v32 = vrot.slane %v2864_v21, 1 }
 0x12e   : > { %1376 = vrot.lane.b32.xlu1 %v1332_v55, %s3138_s9  ;;  %v1642_v55 = vor.u32 %v1641_v12, %v1637_v25  ;;  %v1242_v16 = vrot.slane %v1240_v42, 1 }
 0x12f   : > { %v4109_v4 = vpop.permute.xlu2 %1262  ;;  %1256 = vrot.lane.b32.xlu0 %v1135_v0, %s3136_s7  ;;  %v1856_v1 = vsel %vm811_vm1, %v1854_v31, %v1855_v3  ;;  %v1844_v0 = vsel %vm811_vm1, %v1842_v13, %v1843_v14  ;;  %v2017_v3 = vsel %vm2015_vm6, %v3779_v53, %v4053_v40  ;;  %v1370_v14 = vrot.slane %v4135_v29, 1 }
 0x130   : > { %v1909_v50 = vpop.permute.xlu1 %1908  ;;  %v1647_v39 = vsel %vm538_vm0, %v1642_v55, %v1646_v7  ;;  %v1243_v34 = vsel %vm538_vm0, %v4034_v56, %v1242_v16  ;;  %v2573_v56 = vld [vmem:[%s3222_s30 + $0x68] sm:$0x1]  ;;  %v1749_v29 = vrot.slane %v1747_v47, 1 }
 0x131   : > { %v2173_v26 = vsel %vm2147_vm10, %v2140_v15, %v1909_v50  ;;  %v1901_v52 = vpop.permute.xlu0 %1900  ;;  %v4151_v50 = vld [vmem:[%s3222_s30 + $0x9c] sm:$0xff]   ;;  %v1027_v21 = vunpack.c.l.b16 %v2573_v56 }
 0x132   : > { %2690 = vmatmul.msk.bf16.vlgmr.msra.gmra.mxu3 %vm2219_vm11, %v2173_v26  ;;  %v2165_v51 = vsel %vm2147_vm10, %v2132_v38, %v1901_v52  ;;  %v3041_v15 = vld [vmem:[%s3222_s30 + $0x9c] sm:$0xf0]  ;;  %v2645_v26 = vld [vmem:[%s3222_s30 + $0xd4] sm:$0x1]  ;;  %v2641_v38 = vld [vmem:[%s3222_s30 + $0xa4] sm:$0x1]  ;;  %v2025_v52 = vsel %vm2015_vm6, %v3936_v46, %v4040_v30 }
 0x133   : > { %2686 = vmatmul.msk.bf16.vlgmr.msra.gmra.mxu2 %vm2219_vm11, %v2165_v51  ;;  %v3042_v51 = vld [vmem:[%s3222_s30 + $0x9c] sm:$0xe]  ;;  %v1547_v25 = vunpack.c.l.b16 %v2645_v26  ;;  %v1543_v31 = vunpack.c.l.b16 %v2641_v38  ;;  %v4204_v6 = vpack.c.b16 %v1027_v21, %v1027_v21  ;;  %v2857_v56 = vld [vmem:[%s3222_s30 + $0x60] sm:$0xe]  ;;  %v2851_v21 = vld [vmem:[%s3222_s30 + $0x30] sm:$0xe] }
 0x135   : > { %1760 = vrot.lane.b32.xlu2 %v1599_v9, %s3139_s10  ;;  %v4183_v13 = vpack.c.b16 %v1547_v25, %v1547_v25  ;;  %v1559_v55 = vpack.c.b16 %v1543_v31, %v1543_v31  ;;  %v4223_v31 = vld [vmem:[%s3222_s30 + $0x3c] sm:$0xf0] }
 0x136   : > { %1496 = vrot.lane.b32.xlu1 %v2818_v23, %s3137_s8  ;;  %v1047_v23 = vpack.c.b16 %v1031_v59, %v1031_v59 }
 0x137   : > { %v4130_v27 = vpop.permute.xlu2 %1398  ;;  %1488 = vrot.lane.b32.xlu0 %v4072_v22, %s3137_s8  ;;  %v4147_v22 = vld [vmem:[%s3222_s30 + $0xcc] sm:$0xf0]  ;;  %v1870_v16 = vrot.slane %v1559_v55, 1 }
 0x138   : > { %v1381_v58 = vpop.permute.xlu1 %1380  ;;  %v1358_v19 = vrot.slane %v1047_v23, 1  ;;  %v1192_v8 = vshll.u32 %v1047_v23, 16  ;;  %v3043_v23 = vor.u32 %v3042_v51, %v3041_v15 }
 0x139   : > { %v1373_v60 = vpop.permute.xlu0 %1372  ;;  %v2058_v12 = vsel %vm2048_vm7, %v2025_v52, %v1381_v58  ;;  %v2569_v58 = vld [vmem:[%s3222_s30 + $0x38] sm:$0x1] }
 0x13a   : > { %v1359_v28 = vsel %vm811_vm1, %v1357_v32, %v1358_v19  ;;  %v1194_v24 = vrot.slane %v1192_v8, 1  ;;  %v2050_v30 = vsel %vm2048_vm7, %v2017_v3, %v1373_v60  ;;  %v1023_v32 = vunpack.c.l.b16 %v2569_v58 }
 0x13b   : > { %v1697_v19 = vshrl.u32 %v4151_v50, 16  ;;  %v1869_v15 = vrot.slane %v3043_v23, 1  ;;  %v2850_v23 = vld [vmem:[%s3222_s30 + $0x30] sm:$0xf0] }
 0x13c   : > { %v1195_v46 = vsel %vm538_vm0, %v3430_v18, %v1194_v24  ;;  %v1699_v18 = vshll.u32 %v4151_v50, 16  ;;  %v4209_v24 = vpack.c.b16 %v1023_v32, %v1023_v32 }
 0x13d   : > { %1896 = vrot.lane.b32.xlu2 %v1856_v1, %s3140_s11  ;;  %v2083_v1 = vsel %vm2081_vm8, %v2050_v30, %v4062_v36  ;;  %v1371_v36 = vsel %vm811_vm1, %v1369_v61, %v1370_v14  ;;  %v2856_v30 = vld [vmem:[%s3222_s30 + $0x60] sm:$0xf0]  ;;  %v4231_v61 = vld [vmem:[%s3222_s30 + $0x6c] sm:$0xff]  }
 0x13e   : > { %1888 = vrot.lane.b32.xlu1 %v1844_v0, %s3140_s11  ;;  %v1701_v8 = vrot.slane %v1699_v18, 1  ;;  %v1096_v25 = vshll.u32 %v4209_v24, 16  ;;  %v2633_v18 = vld [vmem:[%s3222_s30 + $0x44] sm:$0x1]  ;;  %v4492_v14 = vld [vmem:[#allocation6_spill] sm:$0xff] }
 0x13f   : > { %v4155_v9 = vpop.permute.xlu2 %1774  ;;  %1768 = vrot.lane.b32.xlu0 %v1647_v39, %s3139_s10  ;;  %v1752_v39 = vshll.u32 %v4183_v13, 16 }
 0x140   : > { %v1757_v49 = vpop.permute.xlu1 %1756  ;;  %v1702_v38 = vor.u32 %v1701_v8, %v1697_v19  ;;  %v1098_v47 = vrot.slane %v1096_v25, 1  ;;  %v2852_v8 = vor.u32 %v2851_v21, %v2850_v23 }
 0x141   : > { %v1493_v54 = vpop.permute.xlu0 %1492  ;;  %v2116_v60 = vsel %vm2114_vm9, %v2083_v1, %v1757_v49  ;;  %v1704_v49 = vshll.u32 %v1559_v55, 16  ;;  %v2858_v1 = vor.u32 %v2857_v56, %v2856_v30 }
 0x142   : > { %v2091_v45 = vsel %vm2081_vm8, %v2058_v12, %v1493_v54  ;;  %v1871_v54 = vsel %vm811_vm1, %v1869_v15, %v1870_v16  ;;  %v4220_v12 = vld [vmem:[%s3222_s30 + $0x3c] sm:$0xff]  }
 0x143   : > { %v2124_v40 = vsel %vm2114_vm9, %v2091_v45, %v4083_v37  ;;  %v1745_v37 = vshrl.u32 %v4144_v5, 16  ;;  %v1706_v51 = vrot.slane %v1704_v49, 1  ;;  %v1345_v19 = vrot.slane %v2858_v1, 1 }
 0x144   : > { %v1603_v49 = vshll.u32 %v4220_v12, 16 }
 0x145   : > { %1394 = vrot.lane.b32.xlu2 %v1359_v28, %s3138_s9  ;;  %v1750_v26 = vor.u32 %v1749_v29, %v1745_v37  ;;  %v1754_v28 = vrot.slane %v1752_v39, 1  ;;  %v1707_v3 = vsel %vm538_vm0, %v1702_v38, %v1706_v51  ;;  %v4493_v37 = vld [vmem:[#allocation5_spill] sm:$0xff]  ;;  %v1535_v29 = vunpack.c.l.b16 %v2633_v18  ;;  %v2637_v39 = vld [vmem:[%s3222_s30 + $0x74] sm:$0x1] }
 0x146   : > { %1274 = vrot.lane.b32.xlu1 %v1243_v34, %s3136_s7  ;;  %v1539_v15 = vunpack.c.l.b16 %v2637_v39  ;;  %v1333_v38 = vrot.slane %v2852_v8, 1  ;;  %v1605_v25 = vrot.slane %v1603_v49, 1 }
 0x147   : > { %v4180_v59 = vpop.permute.xlu2 %1910  ;;  %1266 = vrot.lane.b32.xlu0 %v1195_v46, %s3136_s7  ;;  %v1755_v11 = vsel %vm538_vm0, %v1750_v26, %v1754_v28  ;;  %v3046_v46 = vor.u32 %v3045_v44, %v4147_v22  ;;  %v1882_v22 = vrot.slane %v4183_v13, 1  ;;  %v1551_v16 = vpack.c.b16 %v1535_v29, %v1535_v29 }
 0x148   : > { %v1893_v53 = vpop.permute.xlu1 %1892  ;;  %v1651_v28 = vshll.u32 %v4231_v61, 16 }
 0x149   : > { %v2157_v7 = vsel %vm2147_vm10, %v2124_v40, %v1893_v53  ;;  %v1885_v0 = vpop.permute.xlu0 %1884  ;;  %v4234_v53 = vld [vmem:[%s3222_s30 + $0x6c] sm:$0xf0]  ;;  %v1881_v58 = vrot.slane %v3046_v46, 1  ;;  %v1846_v39 = vrot.slane %v1551_v16, 1 }
 0x14a   : > { %2682 = vmatmul.msk.bf16.vlgmr.msra.gmra.mxu1 %vm2219_vm11, %v2157_v7  ;;  %v2149_v42 = vsel %vm2147_vm10, %v2116_v60, %v1885_v0  ;;  %v2035_v60 = vsel %vm2015_vm6, %v3861_v10, %v4109_v4  ;;  %v1346_v4 = vrot.slane %v4204_v6, 1  ;;  %v1653_v46 = vrot.slane %v1651_v28, 1 }
 0x14b   : > { %2678 = vmatmul.msk.bf16.vlgmr.msra.gmra.mxu0 %vm2219_vm11, %v2149_v42  ;;  %v1099_v42 = vsel %vm538_vm0, %v4493_v37, %v1098_v47 }
 0x14d   : > { %1514 = vrot.lane.b32.xlu2 %v4144_v5, %s3137_s8 }
 0x14e   : > { %1506 = vrot.lane.b32.xlu1 %v4151_v50, %s3137_s8  ;;  %v1144_v50 = vshll.u32 %v4204_v6, 16  ;;  %v1334_v6 = vrot.slane %v4209_v24, 1  ;;  %v1649_v24 = vshrl.u32 %v4231_v61, 16 }
 0x14f   : > { %1402 = vrot.lane.b32.xlu0 %v1371_v36, %s3138_s9  ;;  %v4212_v52 = vpop.permute.xlu2 %1374  ;;  %v1883_v36 = vsel %vm811_vm1, %v1881_v58, %v1882_v22 }
 0x150   : > { %v1391_v5 = vpop.permute.xlu1 %1390  ;;  %v1146_v45 = vrot.slane %v1144_v50, 1  ;;  %v1347_v50 = vsel %vm811_vm1, %v1345_v19, %v1346_v4  ;;  %v1335_v47 = vsel %vm811_vm1, %v1333_v38, %v1334_v6  ;;  %v1654_v18 = vor.u32 %v1653_v46, %v1649_v24 }
 0x151   : > { %v1271_v34 = vpop.permute.xlu0 %1270  ;;  %v2068_v32 = vsel %vm2048_vm7, %v2035_v60, %v1391_v5 }
 0x152   : > { %v1147_v55 = vsel %vm538_vm0, %v4492_v14, %v1146_v45  ;;  %v2043_v10 = vsel %vm2015_vm6, %v4028_v41, %v1271_v34  ;;  %v3048_v45 = vld [vmem:[%s3222_s30 + $0x6c] sm:$0xe] }
 0x153   : > { %v2076_v41 = vsel %vm2048_vm7, %v2043_v10, %v4130_v27  ;;  %v1608_v27 = vshll.u32 %v1551_v16, 16 }
 0x155   : > { %1906 = vrot.lane.b32.xlu2 %v1871_v54, %s3140_s11 }
 0x156   : > { %1786 = vrot.lane.b32.xlu1 %v1755_v11, %s3139_s10  ;;  %v1601_v11 = vshrl.u32 %v4220_v12, 16 }
 0x157   : > { %1778 = vrot.lane.b32.xlu0 %v1707_v3, %s3139_s10  ;;  %v4246_v0 = vpop.permute.xlu2 %1494 }
 0x158   : > { %v1511_v40 = vpop.permute.xlu1 %1510 }
 0x159   : > { %v1503_v7 = vpop.permute.xlu0 %1502  ;;  %v2109_v54 = vsel %vm2081_vm8, %v2076_v41, %v1511_v40  ;;  %v3051_v40 = vld [vmem:[%s3222_s30 + $0x3c] sm:$0xe]  ;;  %s199_s30 = sand.u32 1, %s3115_s13  }
 0x15a   : > { %v2101_v13 = vsel %vm2081_vm8, %v2068_v32, %v1503_v7  ;;  %v3049_v7 = vor.u32 %v3048_v45, %v4234_v53  ;;  %v3052_v23 = vor.u32 %v3051_v40, %v4223_v31 }
 0x15b   : > { %v2134_v26 = vsel %vm2114_vm9, %v2101_v13, %v4155_v9  ;;  %v1555_v9 = vpack.c.b16 %v1539_v15, %v1539_v15 }
 0x15c   : > { %v1857_v60 = vrot.slane %v3049_v7, 1  ;;  %v1845_v29 = vrot.slane %v3052_v23, 1 }
 0x15d   : > { %1258 = vrot.lane.b32.xlu2 %v1147_v55, %s3136_s7  ;;  %v1656_v30 = vshll.u32 %v1555_v9, 16  ;;  %v1606_v55 = vor.u32 %v1605_v25, %v1601_v11  ;;  %v1858_v37 = vrot.slane %v1555_v9, 1 }
 0x15e   : > { %1250 = vrot.lane.b32.xlu1 %v1099_v42, %s3136_s7  ;;  %v1847_v53 = vsel %vm811_vm1, %v1845_v29, %v1846_v39 }
 0x15f   : > { %1914 = vrot.lane.b32.xlu0 %v1883_v36, %s3140_s11  ;;  %v1887_v56 = vpop.permute.xlu2 %1886  ;;  %v1658_v14 = vrot.slane %v1656_v30, 1  ;;  %v1859_v13 = vsel %vm811_vm1, %v1857_v60, %v1858_v37 }
 0x160   : > { %v1903_v44 = vpop.permute.xlu1 %1902 }
 0x161   : > { %v2167_v5 = vsel %vm2147_vm10, %v2134_v26, %v1903_v44  ;;  %v1783_v51 = vpop.permute.xlu0 %1782 }
 0x162   : > { %2687 = vmatmul.msk.bf16.gmra.mxu2 %vm2219_vm11, %v2167_v5  ;;  %v2142_v34 = vsel %vm2114_vm9, %v2109_v54, %v1783_v51 }
 0x163   : > { %v2175_v3 = vsel %vm2147_vm10, %v2142_v34, %v4180_v59  ;;  %v1610_v59 = vrot.slane %v1608_v27, 1 }
 0x164   : > { %2691 = vmatmul.msk.bf16.gmra.mxu3 %vm2219_vm11, %v2175_v3 }
 0x165   : > { %1490 = vrot.lane.b32.xlu2 %v4220_v12, %s3137_s8  ;;  %v1659_v12 = vsel %vm538_vm0, %v1654_v18, %v1658_v14  ;;  %v1611_v1 = vsel %vm538_vm0, %v1606_v55, %v1610_v59 }
 0x166   : > { %1386 = vrot.lane.b32.xlu1 %v1347_v50, %s3138_s9 }
 0x167   : > { %1378 = vrot.lane.b32.xlu0 %v1335_v47, %s3138_s9  ;;  %v1273_v21 = vpop.permute.xlu2 %1272  ;;  %s2532_s9 = sshll.u32 %s199_s30, 8 }
 0x168   : > { %v1255_v58 = vpop.permute.xlu1 %1254  ;;  %v2045_v51 = vsel %vm2015_vm6, %v4022_v17, %v1273_v21  ;;  %v4341_v21 = vld [vmem:[%s4484_s2] ss:$0 sm:$0xff] }
 0x169   : > { %v1247_v22 = vpop.permute.xlu0 %1246  ;;  %v2027_v16 = vsel %vm2015_vm6, %v3929_v48, %v1255_v58 }
 0x16a   : > { %v2019_v36 = vsel %vm2015_vm6, %v3909_v20, %v1247_v22 }
 0x16d   : > { %1770 = vrot.lane.b32.xlu2 %v1659_v12, %s3139_s10 }
 0x16e   : > { %1762 = vrot.lane.b32.xlu1 %v1611_v1, %s3139_s10  ;;  %s4350_s10 = scalar_lea.vmem [#allocation2], %s2532_s9 }
 0x16f   : > { %1498 = vrot.lane.b32.xlu0 %v4231_v61, %s3137_s8  ;;  %v1505_v19 = vpop.permute.xlu2 %1504  ;;  %v2052_v61 = vsel %vm2048_vm7, %v2019_v36, %v4212_v52  ;;  %s2423_s23 = sshll.u32 %s4350_s10, 4  ;;  %s2424_s23 = int_to_ptr.vmem [resolvable:$true] %s2423_s23 }
 0x170   : > { %v1487_v42 = vpop.permute.xlu1 %1486 }
 0x171   : > { %v1383_v32 = vpop.permute.xlu0 %1382  ;;  %v2085_v8 = vsel %vm2081_vm8, %v2052_v61, %v1487_v42 }
 0x172   : > { %v2060_v20 = vsel %vm2048_vm7, %v2027_v16, %v1383_v32 }
 0x173   : > { %v2093_v44 = vsel %vm2081_vm8, %v2060_v20, %v4246_v0 }
 0x176   : > { %1898 = vrot.lane.b32.xlu1 %v1859_v13, %s3140_s11 }
 0x177   : > { %1890 = vrot.lane.b32.xlu0 %v1847_v53, %s3140_s11  ;;  %v1785_v28 = vpop.permute.xlu2 %1784  ;;  %s2703_s11 = sshll.u32 %s3123_s15, 8  ;;  %s2410_s15 = scalar_lea.sflag [#allocation3], %s199_s30 }
 0x178   : > { %v1767_v31 = vpop.permute.xlu1 %1766  ;;  %s2422_s21 = scalar_lea.hbm %s4485_s3, %s2703_s11 }
 0x179   : > { %v1759_v10 = vpop.permute.xlu0 %1758  ;;  %v2126_v52 = vsel %vm2114_vm9, %v2093_v44, %v1767_v31  ;;  %s2425_s26 = sshll.u32 %s2422_s21, 4  ;;  %s2426_s26 = int_to_ptr.hbm [resolvable:$true] %s2425_s26 }
 0x17a   : > { %v2118_v4 = vsel %vm2114_vm9, %v2085_v8, %v1759_v10  ;;  %s3067_s27 = sshra.s32 %s2426_s26, 4  ;;  %s3068_s27 = int_to_ptr.hbm [resolvable:$true] %s3067_s27 }
 0x17b   : > { %v2151_v15 = vsel %vm2147_vm10, %v2118_v4, %v1887_v56  ;;  %s3069_s28 = scalar_lea.hbm %s3068_s27, 256  ;;  %p3074_p1 = scmp.lt.s32.totalorder %s3068_s27, %s4485_s3 }
 0x17c   : > { %2679 = vmatmul.msk.bf16.gmra.mxu0 %vm2219_vm11, %v2151_v15  ;;  %p3070_p12 = scmp.ne.s32.totalorder %s3068_s27, %s3069_s28  ;;  %p3075_p2 = scmp.lt.s32.totalorder %s3073_s6, %s3069_s28 }
 0x17e   : > { %p3071_p13 = pnand %p3070_p12, %p3202_p4  ;;  %p3076_p3 = por %p3075_p2, %p3074_p1 }
 0x17f   : > { %v1249_v6 = vpop.permute.xlu2 %1248 }
 0x180   : > { %v1265_v49 = vpop.permute.xlu1 %1264  ;;  %v2021_v18 = vsel %vm2015_vm6, %v3900_v35, %v1249_v6  ;;  %p3072_p0 = pneg %p3071_p13 }
 0x181   : > { %v1895_v26 = vpop.permute.xlu0 %1894  ;;  %v2037_v0 = vsel %vm2015_vm6, %v3994_v2, %v1265_v49 }
 0x182   : > { %v2159_v41 = vsel %vm2147_vm10, %v2126_v52, %v1895_v26  ;;  %p3077_p5 = pnand %p3076_p3, %p3072_p0 }
 0x183   : > { %2683 = vmatmul.msk.bf16.gmra.mxu1 %vm2219_vm11, %v2159_v41 }
 0x187   : > { %v1385_v11 = vpop.permute.xlu2 %1384 }
 0x188   : > { %v1401_v5 = vpop.permute.xlu1 %1400 }
 0x189   : > { %v1393_v38 = vpop.permute.xlu0 %1392  ;;  %v2078_v50 = vsel %vm2048_vm7, %v2045_v51, %v1401_v5 }
 0x18a   : > { %v2070_v34 = vsel %vm2048_vm7, %v2037_v0, %v1393_v38 }
 0x18b   : > { %v2103_v3 = vsel %vm2081_vm8, %v2070_v34, %v1505_v19 }
 0x18f   : > { %v1761_v30 = vpop.permute.xlu2 %1760 }
 0x190   : > { %v1777_v48 = vpop.permute.xlu1 %1776 }
 0x191   : > { %v1513_v54 = vpop.permute.xlu0 %1512  ;;  %v2136_v24 = vsel %vm2114_vm9, %v2103_v3, %v1777_v48 }
 0x192   : > { %v2111_v9 = vsel %vm2081_vm8, %v2078_v50, %v1513_v54 }
 0x193   : > { %v2144_v27 = vsel %vm2114_vm9, %v2111_v9, %v1785_v28 }
 0x197   : > { %v1897_v14 = vpop.permute.xlu2 %1896 }
 0x198   : > { %v1913_v25 = vpop.permute.xlu1 %1912 }
 0x199   : > { %v2177_v45 = vsel %vm2147_vm10, %v2144_v27, %v1913_v25  ;;  %v1905_v17 = vpop.permute.xlu0 %1904 }
 0x19a   : > { %2692 = vmatmul.msk.bf16.gmra.mxu3 %vm2219_vm11, %v2177_v45  ;;  %v2169_v46 = vsel %vm2147_vm10, %v2136_v24, %v1905_v17 }
 0x19b   : > { %2688 = vmatmul.msk.bf16.gmra.mxu2 %vm2219_vm11, %v2169_v46 }
 0x19f   : > { %v1395_v37 = vpop.permute.xlu2 %1394 }
 0x1a0   : > { %v1377_v2 = vpop.permute.xlu1 %1376 }
 0x1a1   : > { %v1257_v56 = vpop.permute.xlu0 %1256  ;;  %v2054_v55 = vsel %vm2048_vm7, %v2021_v18, %v1377_v2 }
 0x1a2   : > { %v2029_v58 = vsel %vm2015_vm6, %v3834_v62, %v1257_v56 }
 0x1a3   : > { %v2062_v1 = vsel %vm2048_vm7, %v2029_v58, %v1385_v11 }
 0x1a7   : > { %v1515_v8 = vpop.permute.xlu2 %1514 }
 0x1a8   : > { %v1497_v47 = vpop.permute.xlu1 %1496 }
 0x1a9   : > { %v1489_v40 = vpop.permute.xlu0 %1488  ;;  %v2095_v23 = vsel %vm2081_vm8, %v2062_v1, %v1497_v47 }
 0x1aa   : > { %v2087_v59 = vsel %vm2081_vm8, %v2054_v55, %v1489_v40 }
 0x1ab   : > { %v2120_v22 = vsel %vm2114_vm9, %v2087_v59, %v1761_v30 }
 0x1af   : > { %v1907_v41 = vpop.permute.xlu2 %1906 }
 0x1b0   : > { %v1889_v12 = vpop.permute.xlu1 %1888 }
 0x1b1   : > { %v2153_v7 = vsel %vm2147_vm10, %v2120_v22, %v1889_v12  ;;  %v1769_v35 = vpop.permute.xlu0 %1768 }
 0x1b2   : > { %2680 = vmatmul.msk.bf16.gmra.mxu0 %vm2219_vm11, %v2153_v7  ;;  %v2128_v62 = vsel %vm2114_vm9, %v2095_v23, %v1769_v35 }
 0x1b3   : > { %v2161_v60 = vsel %vm2147_vm10, %v2128_v62, %v1897_v14 }
 0x1b4   : > { %2684 = vmatmul.msk.bf16.gmra.mxu1 %vm2219_vm11, %v2161_v60 }
 0x1b5   : > { %v2325_v42 = vpop.f32.mrf.mxu3 }
 0x1b6   : > { %v2326_v29 = vadd.f32 %v4341_v21, %v2325_v42  ;;  %v2305_v39 = vpop.f32.mrf.mxu2 }
 0x1b7   : > { %v2306_v32 = vadd.f32 %v4341_v21, %v2305_v39  ;;  %v1259_v2 = vpop.permute.xlu2 %1258 }
 0x1b8   : > { %v2369_v13 = vmax.f32 %v2326_v29, 0.0  ;;  %v1275_v53 = vpop.permute.xlu1 %1274  ;;  %v2031_v59 = vsel %vm2015_vm6, %v3965_v57, %v1259_v2 }
 0x1b9   : > { %v2361_v36 = vmax.f32 %v2306_v32, 0.0  ;;  %v1267_v31 = vpop.permute.xlu0 %1266  ;;  %v2047_v9 = vsel %vm2015_vm6, %v3922_v43, %v1275_v53 }
 0x1ba   : > { %2401 = vst [vmem:[%s4350_s10 + $0xc0] sm:$0xff] %v2369_v13  ;;  %v2039_v44 = vsel %vm2015_vm6, %v3989_v63, %v1267_v31 }
 0x1bb   : > { %2393 = vst [vmem:[%s4350_s10 + $0x80] sm:$0xff] %v2361_v36  ;;  %v2072_v5 = vsel %vm2048_vm7, %v2039_v44, %v1395_v37 }
 0x1bd   : > { %v2327_v19 = vpop.f32.mrf.mxu3 }
 0x1be   : > { %v2328_v61 = vadd.f32 %v4341_v21, %v2327_v19  ;;  %v2307_v10 = vpop.f32.mrf.mxu2 }
 0x1bf   : > { %v2308_v4 = vadd.f32 %v4341_v21, %v2307_v10  ;;  %v1491_v18 = vpop.permute.xlu2 %1490 }
 0x1c0   : > { %v2370_v15 = vmax.f32 %v2328_v61, 0.0  ;;  %v1507_v16 = vpop.permute.xlu1 %1506 }
 0x1c1   : > { %v2362_v20 = vmax.f32 %v2308_v4, 0.0  ;;  %v1403_v49 = vpop.permute.xlu0 %1402  ;;  %v2105_v6 = vsel %vm2081_vm8, %v2072_v5, %v1507_v16 }
 0x1c2   : > { %2402 = vst [vmem:[%s4350_s10 + $0xc8] sm:$0xff] %v2370_v15  ;;  %v2080_v34 = vsel %vm2048_vm7, %v2047_v9, %v1403_v49 }
 0x1c3   : > { %2394 = vst [vmem:[%s4350_s10 + $0x88] sm:$0xff] %v2362_v20  ;;  %v2113_v3 = vsel %vm2081_vm8, %v2080_v34, %v1515_v8 }
 0x1c7   : > { %v2285_v52 = vpop.f32.mrf.mxu1  ;;  %v1771_v1 = vpop.permute.xlu2 %1770 }
 0x1c8   : > { %v2286_v26 = vadd.f32 %v4341_v21, %v2285_v52  ;;  %v1787_v28 = vpop.permute.xlu1 %1786  ;;  %v2265_v38 = vpop.f32.mrf.mxu0 }
 0x1c9   : > { %v2266_v48 = vadd.f32 %v4341_v21, %v2265_v38  ;;  %v1779_v51 = vpop.permute.xlu0 %1778  ;;  %v2146_v24 = vsel %vm2114_vm9, %v2113_v3, %v1787_v28 }
 0x1ca   : > { %v2353_v54 = vmax.f32 %v2286_v26, 0.0  ;;  %v2138_v50 = vsel %vm2114_vm9, %v2105_v6, %v1779_v51 }
 0x1cb   : > { %v2345_v0 = vmax.f32 %v2266_v48, 0.0  ;;  %v2171_v63 = vsel %vm2147_vm10, %v2138_v50, %v1907_v41 }
 0x1cc   : > { %2385 = vst [vmem:[%s4350_s10 + $0x40] sm:$0xff] %v2353_v54  ;;  %2689 = vmatmul.msk.bf16.gmra.mxu2 %vm2219_vm11, %v2171_v63 }
 0x1cd   : > { %2377 = vst [vmem:[%s4350_s10] sm:$0xff] %v2345_v0 }
 0x1cf   : > { %v2287_v11 = vpop.f32.mrf.mxu1 }
 0x1d0   : > { %v2288_v25 = vadd.f32 %v4341_v21, %v2287_v11  ;;  %v1251_v27 = vpop.permute.xlu1 %1250  ;;  %v2267_v45 = vpop.f32.mrf.mxu0 }
 0x1d1   : > { %v2268_v17 = vadd.f32 %v4341_v21, %v2267_v45  ;;  %v1915_v43 = vpop.permute.xlu0 %1914  ;;  %v2023_v12 = vsel %vm2015_vm6, %v3811_v33, %v1251_v27 }
 0x1d2   : > { %v2354_v46 = vmax.f32 %v2288_v25, 0.0  ;;  %v2179_v30 = vsel %vm2147_vm10, %v2146_v24, %v1915_v43 }
 0x1d3   : > { %v2346_v56 = vmax.f32 %v2268_v17, 0.0  ;;  %2693 = vmatmul.msk.bf16.gmra.mxu3 %vm2219_vm11, %v2179_v30 }
 0x1d4   : > { %2386 = vst [vmem:[%s4350_s10 + $0x48] sm:$0xff] %v2354_v46 }
 0x1d5   : > { %2378 = vst [vmem:[%s4350_s10 + $0x8] sm:$0xff] %v2346_v56 }
 0x1d8   : > { %v1387_v47 = vpop.permute.xlu1 %1386 }
 0x1d9   : > { %v1379_v40 = vpop.permute.xlu0 %1378  ;;  %v2064_v58 = vsel %vm2048_vm7, %v2031_v59, %v1387_v47 }
 0x1da   : > { %v2056_v23 = vsel %vm2048_vm7, %v2023_v12, %v1379_v40 }
 0x1db   : > { %v2089_v42 = vsel %vm2081_vm8, %v2056_v23, %v1491_v18 }
 0x1e0   : > { %v1763_v14 = vpop.permute.xlu1 %1762 }
 0x1e1   : > { %v1499_v55 = vpop.permute.xlu0 %1498  ;;  %v2122_v39 = vsel %vm2114_vm9, %v2089_v42, %v1763_v14 }
 0x1e2   : > { %v2097_v22 = vsel %vm2081_vm8, %v2064_v58, %v1499_v55 }
 0x1e3   : > { %v2130_v62 = vsel %vm2114_vm9, %v2097_v22, %v1771_v1 }
 0x1e5   : > { %v2310_v7 = vpop.f32.mrf.mxu2 }
 0x1e6   : > { %v2311_v35 = vadd.f32 %v4341_v21, %v2310_v7 }
 0x1e7   : > { %v2330_v37 = vpop.f32.mrf.mxu3 }
 0x1e8   : > { %v2363_v60 = vmax.f32 %v2311_v35, 0.0  ;;  %v1899_v57 = vpop.permute.xlu1 %1898  ;;  %v2331_v29 = vadd.f32 %v4341_v21, %v2330_v37 }
 0x1e9   : > { %v2163_v33 = vsel %vm2147_vm10, %v2130_v62, %v1899_v57  ;;  %v1891_v32 = vpop.permute.xlu0 %1890 }
 0x1ea   : > { %2395 = vst [vmem:[%s4350_s10 + $0x90] sm:$0xff] %v2363_v60  ;;  %2685 = vmatmul.msk.bf16.gmra.mxu1 %vm2219_vm11, %v2163_v33  ;;  %v2371_v13 = vmax.f32 %v2331_v29, 0.0  ;;  %v2155_v53 = vsel %vm2147_vm10, %v2122_v39, %v1891_v32 }
 0x1eb   : > { %2681 = vmatmul.msk.bf16.gmra.mxu0 %vm2219_vm11, %v2155_v53 }
 0x1ec   : > { %2403 = vst [vmem:[%s4350_s10 + $0xd0] sm:$0xff] %v2371_v13 }
 0x1ed   : > { %v2312_v36 = vpop.f32.mrf.mxu2 }
 0x1ee   : > { %v2313_v31 = vadd.f32 %v4341_v21, %v2312_v36 }
 0x1ef   : > { %v2332_v61 = vpop.f32.mrf.mxu3 }
 0x1f0   : > { %v2364_v19 = vmax.f32 %v2313_v31, 0.0  ;;  %v2333_v8 = vadd.f32 %v4341_v21, %v2332_v61 }
 0x1f2   : > { %2396 = vst [vmem:[%s4350_s10 + $0x98] sm:$0xff] %v2364_v19  ;;  %v2372_v10 = vmax.f32 %v2333_v8, 0.0 }
 0x1f4   : > { %2404 = vst [vmem:[%s4350_s10 + $0xd8] sm:$0xff] %v2372_v10 }
 0x1f9   : > { %v2270_v4 = vpop.f32.mrf.mxu0 }
 0x1fa   : > { %v2271_v15 = vadd.f32 %v4341_v21, %v2270_v4 }
 0x1fc   : > { %v2347_v16 = vmax.f32 %v2271_v15, 0.0 }
 0x1fe   : > { %2379 = vst [vmem:[%s4350_s10 + $0x10] sm:$0xff] %v2347_v16 }
 0x200   : > { %v2290_v20 = vpop.f32.mrf.mxu1 }
 0x201   : > { %v2291_v49 = vadd.f32 %v4341_v21, %v2290_v20  ;;  %v2272_v44 = vpop.f32.mrf.mxu0 }
 0x202   : > { %v2273_v52 = vadd.f32 %v4341_v21, %v2272_v44 }
 0x203   : > { %v2355_v26 = vmax.f32 %v2291_v49, 0.0 }
 0x204   : > { %v2348_v28 = vmax.f32 %v2273_v52, 0.0 }
 0x205   : > { %2387 = vst [vmem:[%s4350_s10 + $0x50] sm:$0xff] %v2355_v26 }
 0x206   : > { %2380 = vst [vmem:[%s4350_s10 + $0x18] sm:$0xff] %v2348_v28 }
 0x208   : > { %v2292_v41 = vpop.f32.mrf.mxu1 }
 0x209   : > { %v2293_v5 = vadd.f32 %v4341_v21, %v2292_v41 }
 0x20b   : > { %v2356_v38 = vmax.f32 %v2293_v5, 0.0 }
 0x20d   : > { %2388 = vst [vmem:[%s4350_s10 + $0x58] sm:$0xff] %v2356_v38 }
 0x21d   : > { %v2335_v6 = vpop.f32.mrf.mxu3 }
 0x21e   : > { %v2336_v48 = vadd.f32 %v4341_v21, %v2335_v6  ;;  %v2315_v54 = vpop.f32.mrf.mxu2 }
 0x21f   : > { %v2316_v51 = vadd.f32 %v4341_v21, %v2315_v54 }
 0x220   : > { %v2373_v50 = vmax.f32 %v2336_v48, 0.0 }
 0x221   : > { %v2365_v0 = vmax.f32 %v2316_v51, 0.0 }
 0x222   : > { %2405 = vst [vmem:[%s4350_s10 + $0xe0] sm:$0xff] %v2373_v50 }
 0x223   : > { %2397 = vst [vmem:[%s4350_s10 + $0xa0] sm:$0xff] %v2365_v0 }
 0x225   : > { %v2337_v63 = vpop.f32.mrf.mxu3 }
 0x226   : > { %v2338_v9 = vadd.f32 %v4341_v21, %v2337_v63  ;;  %v2317_v34 = vpop.f32.mrf.mxu2 }
 0x227   : > { %v2318_v11 = vadd.f32 %v4341_v21, %v2317_v34 }
 0x228   : > { %v2374_v25 = vmax.f32 %v2338_v9, 0.0 }
 0x229   : > { %v2366_v27 = vmax.f32 %v2318_v11, 0.0 }
 0x22a   : > { %2406 = vst [vmem:[%s4350_s10 + $0xe8] sm:$0xff] %v2374_v25 }
 0x22b   : > { %2398 = vst [vmem:[%s4350_s10 + $0xa8] sm:$0xff] %v2366_v27 }
 0x22f   : > { %v2275_v3 = vpop.f32.mrf.mxu0 }
 0x230   : > { %v2276_v45 = vadd.f32 %v4341_v21, %v2275_v3 }
 0x231   : > { %v2295_v17 = vpop.f32.mrf.mxu1 }
 0x232   : > { %v2349_v24 = vmax.f32 %v2276_v45, 0.0  ;;  %v2296_v46 = vadd.f32 %v4341_v21, %v2295_v17 }
 0x234   : > { %2381 = vst [vmem:[%s4350_s10 + $0x20] sm:$0xff] %v2349_v24  ;;  %v2357_v43 = vmax.f32 %v2296_v46, 0.0 }
 0x236   : > { %2389 = vst [vmem:[%s4350_s10 + $0x60] sm:$0xff] %v2357_v43 }
 0x237   : > { %v2277_v2 = vpop.f32.mrf.mxu0 }
 0x238   : > { %v2278_v30 = vadd.f32 %v4341_v21, %v2277_v2 }
 0x239   : > { %v2297_v47 = vpop.f32.mrf.mxu1 }
 0x23a   : > { %v2350_v56 = vmax.f32 %v2278_v30, 0.0  ;;  %v2298_v40 = vadd.f32 %v4341_v21, %v2297_v47 }
 0x23c   : > { %2382 = vst [vmem:[%s4350_s10 + $0x28] sm:$0xff] %v2350_v56  ;;  %v2358_v18 = vmax.f32 %v2298_v40, 0.0 }
 0x23e   : > { %2390 = vst [vmem:[%s4350_s10 + $0x68] sm:$0xff] %v2358_v18 }
 0x24f   : > { %v2320_v14 = vpop.f32.mrf.mxu2 }
 0x250   : > { %v2321_v55 = vadd.f32 %v4341_v21, %v2320_v14 }
 0x252   : > { %v2367_v59 = vmax.f32 %v2321_v55, 0.0 }
 0x254   : > { %2399 = vst [vmem:[%s4350_s10 + $0xb0] sm:$0xff] %v2367_v59 }
 0x256   : > { %v2340_v58 = vpop.f32.mrf.mxu3 }
 0x257   : > { %v2341_v12 = vadd.f32 %v4341_v21, %v2340_v58  ;;  %v2322_v22 = vpop.f32.mrf.mxu2 }
 0x258   : > { %v2323_v1 = vadd.f32 %v4341_v21, %v2322_v22 }
 0x259   : > { %v2375_v7 = vmax.f32 %v2341_v12, 0.0 }
 0x25a   : > { %v2368_v23 = vmax.f32 %v2323_v1, 0.0 }
 0x25b   : > { %2407 = vst [vmem:[%s4350_s10 + $0xf0] sm:$0xff] %v2375_v7 }
 0x25c   : > { %2400 = vst [vmem:[%s4350_s10 + $0xb8] sm:$0xff] %v2368_v23 }
 0x25e   : > { %v2342_v35 = vpop.f32.mrf.mxu3 }
 0x25f   : > { %v2343_v62 = vadd.f32 %v4341_v21, %v2342_v35 }
 0x261   : > { %v2376_v60 = vmax.f32 %v2343_v62, 0.0 }
 0x263   : > { %2408 = vst [vmem:[%s4350_s10 + $0xf8] sm:$0xff] %v2376_v60 }
 0x267   : > { %v2300_v37 = vpop.f32.mrf.mxu1 }
 0x268   : > { %v2301_v57 = vadd.f32 %v4341_v21, %v2300_v37  ;;  %v2280_v42 = vpop.f32.mrf.mxu0 }
 0x269   : > { %v2281_v29 = vadd.f32 %v4341_v21, %v2280_v42 }
 0x26a   : > { %v2359_v33 = vmax.f32 %v2301_v57, 0.0 }
 0x26b   : > { %v2351_v39 = vmax.f32 %v2281_v29, 0.0 }
 0x26c   : > { %2391 = vst [vmem:[%s4350_s10 + $0x70] sm:$0xff] %v2359_v33 }
 0x26d   : > { %2383 = vst [vmem:[%s4350_s10 + $0x30] sm:$0xff] %v2351_v39 }
 0x26f   : > { %v2302_v32 = vpop.f32.mrf.mxu1 }
 0x270   : > { %v2303_v13 = vadd.f32 %v4341_v21, %v2302_v32  ;;  %v2282_v53 = vpop.f32.mrf.mxu0 }
 0x271   : > { %v2283_v36 = vadd.f32 %v4341_v21, %v2282_v53 }
 0x272   : > { %v2360_v31 = vmax.f32 %v2303_v13, 0.0 }
 0x273   : > { %v2352_v19 = vmax.f32 %v2283_v36, 0.0 }
 0x274   : > { %2392 = vst [vmem:[%s4350_s10 + $0x78] sm:$0xff] %v2360_v31 }
 0x275   : > { %2384 = vst [vmem:[%s4350_s10 + $0x38] sm:$0xff] %v2352_v19 }
 0x276   : > { %3080 = shalt.err (!%p3077_p5)
}
 0x277   : > { %s3141_s30 = smov 128  }
 0x278   : > { %2911 = dma.vmem_to_hbm [thread:$0]  (%p3202_p4), %s2424_s23, 4096, %s2426_s26, %s2410_s15, %s3141_s30, %s3141_s30, %s3133_s4  }
 0x279 PF: > { %p2917_p6 = scmp.ge.s32.totalorder %s3131_s17, 2  ;;  %s2440_s9 = sand.u32 1, %s3111_s12  }
 0x27a   : > { %s2441_s10 = scalar_lea.sflag [#allocation3], %s2440_s9 }
 0x27b   : > { %p2914_p7 = pnand %p2917_p6, %p3209_p8 }
 0x27d   : > { %p2915_p9 = pneg %p2914_p7 }
 0x27f   : > { %3106 = dma.done.wait (%p2915_p9), %s2441_s10, 4096  }
 0x280   : > { %3108 = vsyncadd (%p2915_p9), %s2441_s10, 4294963200  ;;  %s16_s17 = sadd.s32 1, %s3131_s17   ;;  %s4494_s12 = smov %s3115_s13 }
 0x281   : > { %p13_p10 = scmp.ge.s32.totalorder %s16_s17, 4   ;;  %s4495_s13 = smov %s3119_s14 }
 0x282   : > { %s4496_s14 = smov %s3215_s25  ;;  %s4497_s15 = smov %s3127_s16 }
 0x283   : > { %s4498_s16 = smov %s4500_s20  ;;  %15 = sbr.rel (!%p13_p10) target bundleno = 4 (0x4), region = 75 }
 0x288   :  { %2447 = vsyncpa [#allocation3], 1 }
 0x289   :  { %2449 = vsyncpa [#allocation3 + $0x1], 1 }

</bundles_post_ra>
